<compile_context>
chip_gen: v6e
topology: v6e:2x2x1
jax: 0.10.0
libtpu: 0.0.40
codegen_flags: <defaults>
</compile_context>

<pallas_src>
import numpy as np
import jax
import jax.numpy as jnp
from jax.experimental import pallas as pl
from jax.experimental.pallas import tpu as pltpu

N_PAD = 128   # matched boxes padded to one full lane width
LANE = 128    # contraction dims padded to a multiple of the lane width


def _round_up(x, m):
    return ((x + m - 1) // m) * m


def _split3_bf16(x):
    """3-term bf16 split of an f32 array; hi+mid+lo reproduces x to ~1 ulp f32."""
    hi = x.astype(jnp.bfloat16)
    r1 = x - hi.astype(jnp.float32)
    mid = r1.astype(jnp.bfloat16)
    lo = (r1 - mid.astype(jnp.float32)).astype(jnp.bfloat16)
    return hi, mid, lo


def _mxu_gather(parts, onehot):
    """Gather columns on the MXU.

    parts  : bf16x3 split of the feature-major data (8, K)
    onehot : (K, N_PAD) exact {0,1} bf16; column n selects source column k
    Returns (8, N_PAD) f32; padded lanes (all-zero one-hot columns) are 0.
    """
    hi, mid, lo = parts
    g = jnp.dot(hi, onehot, preferred_element_type=jnp.float32)
    g = g + jnp.dot(mid, onehot, preferred_element_type=jnp.float32)
    g = g + jnp.dot(lo, onehot, preferred_element_type=jnp.float32)
    return g


def boxes3d_loss_kernel(inv_nb_ref, counts_ref, pred_ref, tgt_ref,
                        oh_src_ref, oh_tgt_ref, out_ref):
    # inv_nb_ref: (1, 1) f32 SMEM            -- 1 / num_boxes
    # counts_ref: (L,)  i32 SMEM             -- matched pairs per instance
    # pred_ref  : (L, 8, BQ_pad) f32 VMEM    -- predictions, feature-major
    # tgt_ref   : (8, T_pad)     f32 VMEM    -- all GT boxes, feature-major (shared)
    # oh_src_ref: (L, BQ_pad, N_PAD) bf16    -- one-hot gather (pred col -> lane)
    # oh_tgt_ref: (L, T_pad,  N_PAD) bf16    -- one-hot gather (tgt col  -> lane)
    # out_ref   : (L, 1, N_PAD) f32 VMEM     -- lanes 0..2 = [bbox, giou, rad]
    num_instances = pred_ref.shape[0]
    inv_nb = inv_nb_ref[0, 0]
    col = jax.lax.broadcasted_iota(jnp.int32, (1, N_PAD), 1)

    # Targets are shared by all instances: split once outside the loop.
    tgt_parts = _split3_bf16(tgt_ref[...])

    for l in range(num_instances):
        # ---- MXU one-hot gather of matched pairs, feature-major (8, N_PAD) ----
        src = _mxu_gather(_split3_bf16(pred_ref[l]), oh_src_ref[l])
        dst = _mxu_gather(tgt_parts, oh_tgt_ref[l])
        valid = col < counts_ref[l]                    # (1, N_PAD); pad lanes False

        # ---- L1 terms: padded lanes are exactly 0-0, so no mask needed ----
        diff_sums = jnp.sum(jnp.abs(src - dst), axis=1, keepdims=True)   # (8, 1)
        loss_bbox = jnp.sum(diff_sums[0:6, :], keepdims=True)            # (1, 1)
        loss_rad = jnp.sum(diff_sums[6:8, :], keepdims=True)             # (1, 1)

        # ---- paired GIoU3D (== diag of the pairwise GIoU matrix) ----
        s_lo = src[0:3, :] - 0.5 * src[3:6, :]
        s_hi = src[0:3, :] + 0.5 * src[3:6, :]
        t_lo = dst[0:3, :] - 0.5 * dst[3:6, :]
        t_hi = dst[0:3, :] + 0.5 * dst[3:6, :]

        def prod3(x):                                  # (3, N_PAD) -> (1, N_PAD)
            return x[0:1, :] * x[1:2, :] * x[2:3, :]

        idim = jnp.maximum(jnp.minimum(s_hi, t_hi) - jnp.maximum(s_lo, t_lo), 0.0)
        edim = jnp.maximum(jnp.maximum(s_hi, t_hi) - jnp.minimum(s_lo, t_lo), 0.0)
        vol_s = prod3(s_hi - s_lo)
        vol_t = prod3(t_hi - t_lo)
        inter = prod3(idim)
        enc = prod3(edim)
        union = vol_s + vol_t - inter

        # Padded (all-zero) lanes would hit 0/0: substitute 1.0 before dividing;
        # those lanes are masked out of the sum below.
        union_s = jnp.where(valid, union, 1.0)
        enc_s = jnp.where(valid, enc, 1.0)
        iou = inter / union_s
        giou = iou - (enc_s - union_s) / enc_s
        loss_giou = jnp.sum(jnp.where(valid, 1.0 - giou, 0.0), keepdims=True)

        # ---- normalize the scalars, pack into a lane-dense (1, N_PAD) row ----
        packed = jnp.where(col == 0, loss_bbox * inv_nb,
                           jnp.where(col == 1, loss_giou * inv_nb,
                                     jnp.where(col == 2, loss_rad * inv_nb, 0.0)))
        out_ref[l] = packed


def boxes3d_loss_batched(pred_boxes, target_boxes_list, indices_per_instance, num_boxes):
    """Batched Boxes3DLoss over L loss instances (e.g. decoder layers).

    pred_boxes: (L, B, Q, 8) predictions per instance.
    target_boxes_list: list (length B) of (num_gt_b, 8) GT boxes, shared by all
        instances (usual aux-loss setup).
    indices_per_instance: length-L list; element l is the per-batch Hungarian
        matching [(src_idx, tgt_idx), ...] (host data, as in the torch module).
    Returns a dict of (L,) arrays.
    """
    L, B, Q, F = pred_boxes.shape
    assert F == 8
    sizes = [int(t.shape[0]) for t in target_boxes_list]
    offsets = np.concatenate([[0], np.cumsum(sizes)]).astype(np.int64)
    T = int(offsets[-1])
    BQ = B * Q
    BQ_pad = _round_up(BQ, LANE)
    T_pad = _round_up(max(T, 1), LANE)

    # ---- host-side (numpy) one-hot gather matrices + matched counts ----
    oh_src = np.zeros((L, BQ_pad, N_PAD), np.float32)
    oh_tgt = np.zeros((L, T_pad, N_PAD), np.float32)
    counts = np.zeros((L,), np.int32)
    for l, idx in enumerate(indices_per_instance):
        pos = 0
        for b, (s, t) in enumerate(idx):
            s = np.asarray(s, dtype=np.int64)
            t = np.asarray(t, dtype=np.int64)
            k = int(s.shape[0])
            assert pos + k <= N_PAD, "more matched boxes than N_PAD lanes"
            oh_src[l, b * Q + s, pos + np.arange(k)] = 1.0
            oh_tgt[l, offsets[b] + t, pos + np.arange(k)] = 1.0
            pos += k
        counts[l] = pos

    # ---- minimal device-side glue: feature-major padded slabs ----
    pred_flat = pred_boxes.reshape(L, BQ, F).astype(jnp.float32)
    pred_flat = jnp.pad(pred_flat, ((0, 0), (0, BQ_pad - BQ), (0, 0)))
    pred_fm = jnp.transpose(pred_flat, (0, 2, 1))                     # (L, 8, BQ_pad)

    tgt_cat = jnp.concatenate(
        [t.astype(jnp.float32) for t in target_boxes_list], axis=0)    # (T, 8)
    tgt_cat = jnp.pad(tgt_cat, ((0, T_pad - T), (0, 0)))
    tgt_fm = jnp.transpose(tgt_cat, (1, 0))                            # (8, T_pad)

    inv_nb = (1.0 / jnp.asarray(num_boxes, jnp.float32)).reshape(1, 1)
    oh_src_bf16 = jnp.asarray(oh_src).astype(jnp.bfloat16)             # exact 0/1
    oh_tgt_bf16 = jnp.asarray(oh_tgt).astype(jnp.bfloat16)

    out = pl.pallas_call(
        boxes3d_loss_kernel,
        out_shape=jax.ShapeDtypeStruct((L, 1, N_PAD), jnp.float32),
        in_specs=[
            pl.BlockSpec(memory_space=pltpu.MemorySpace.SMEM),   # 1/num_boxes
            pl.BlockSpec(memory_space=pltpu.MemorySpace.SMEM),   # matched counts
            pl.BlockSpec(memory_space=pltpu.MemorySpace.VMEM),   # predictions
            pl.BlockSpec(memory_space=pltpu.MemorySpace.VMEM),   # targets (shared)
            pl.BlockSpec(memory_space=pltpu.MemorySpace.VMEM),   # one-hot (src)
            pl.BlockSpec(memory_space=pltpu.MemorySpace.VMEM),   # one-hot (tgt)
        ],
        out_specs=pl.BlockSpec(memory_space=pltpu.MemorySpace.VMEM),
    )(inv_nb, jnp.asarray(counts), pred_fm, tgt_fm, oh_src_bf16, oh_tgt_bf16)

    return {
        'loss_bbox': out[:, 0, 0],
        'loss_giou': out[:, 0, 1],
        'loss_rad': out[:, 0, 2],
    }


def boxes3d_loss(pred_boxes, target_boxes_list, indices, num_boxes):
    """Single-instance API matching the torch module's forward()."""
    out = boxes3d_loss_batched(pred_boxes[None], target_boxes_list,
                               [indices], num_boxes)
    return {k: v[0] for k, v in out.items()}


def boxes3d_loss_ref(pred_boxes, target_boxes_list, indices, num_boxes):
    """Plain-JAX reference mirroring the PyTorch module (single instance)."""
    src = jnp.concatenate(
        [pred_boxes[b][np.asarray(s)] for b, (s, _) in enumerate(indices)], axis=0)
    tgt = jnp.concatenate(
        [target_boxes_list[b][np.asarray(t)] for b, (_, t) in enumerate(indices)], axis=0)
    src_b, src_r = src[:, :6], src[:, 6:]
    tgt_b, tgt_r = tgt[:, :6], tgt[:, 6:]
    loss_bbox = jnp.sum(jnp.abs(src_b - tgt_b)) / num_boxes
    loss_rad = jnp.sum(jnp.abs(src_r - tgt_r)) / num_boxes

    def to_xyxyxy(b):
        c, d = b[:, :3], b[:, 3:6]
        return jnp.concatenate([c - 0.5 * d, c + 0.5 * d], axis=-1)

    s, t = to_xyxyxy(src_b), to_xyxyxy(tgt_b)
    vol_s = jnp.prod(s[:, 3:] - s[:, :3], axis=-1)
    vol_t = jnp.prod(t[:, 3:] - t[:, :3], axis=-1)
    inter = jnp.prod(jnp.clip(jnp.minimum(s[:, 3:], t[:, 3:])
                              - jnp.maximum(s[:, :3], t[:, :3]), 0.0), axis=-1)
    union = vol_s + vol_t - inter
    iou = inter / union
    enc = jnp.prod(jnp.clip(jnp.maximum(s[:, 3:], t[:, 3:])
                            - jnp.minimum(s[:, :3], t[:, :3]), 0.0), axis=-1)
    giou = iou - (enc - union) / enc
    loss_giou = jnp.sum(1.0 - giou) / num_boxes
    return {'loss_bbox': loss_bbox, 'loss_giou': loss_giou, 'loss_rad': loss_rad}


def _make_boxes(key, n):
    """Boxes in cx,cy,cz,l,w,h,rad0,rad1 format with positive extents."""
    k1, k2, k3 = jax.random.split(key, 3)
    centers = jax.random.uniform(k1, (n, 3), jnp.float32, -2.0, 2.0)
    dims = jax.random.uniform(k2, (n, 3), jnp.float32, 0.5, 2.0)
    rads = jax.random.uniform(k3, (n, 2), jnp.float32, -1.0, 1.0)
    return jnp.concatenate([centers, dims, rads], axis=-1)


if __name__ == "__main__":
    key = jax.random.PRNGKey(0)
    k_pred, k_t0, k_t1 = jax.random.split(key, 3)

    L, B, Q = 3, 2, 64   # 3 loss instances (e.g. decoder layers), batch 2, 64 queries
    pred_boxes = jnp.stack([
        jnp.stack([_make_boxes(jax.random.fold_in(k_pred, l * B + b), Q)
                   for b in range(B)])
        for l in range(L)])                                   # (L, B, Q, 8)

    target_boxes_list = [_make_boxes(k_t0, 5), _make_boxes(k_t1, 6)]

    # Hungarian-style matching (host data), re-matched per instance
    indices_per_instance = [
        [(np.array([0, 3, 7]), np.array([1, 0, 4])),
         (np.array([2, 5, 9, 11, 15]), np.array([0, 2, 3, 1, 5]))],
        [(np.array([1, 4, 6]), np.array([0, 2, 3])),
         (np.array([0, 3, 8, 10, 14]), np.array([5, 1, 2, 4, 0]))],
        [(np.array([2, 6, 12]), np.array([4, 3, 2])),
         (np.array([1, 4, 7, 9, 13]), np.array([2, 0, 5, 3, 1]))],
    ]
    num_boxes = 8.0

    # one pallas_call (no grid) processes all L loss instances
    losses = jax.block_until_ready(
        boxes3d_loss_batched(pred_boxes, target_boxes_list,
                             indices_per_instance, num_boxes))

    for l in range(L):
        ref = boxes3d_loss_ref(pred_boxes[l], target_boxes_list,
                               indices_per_instance[l], num_boxes)
        for k in ('loss_bbox', 'loss_giou', 'loss_rad'):
            np.testing.assert_allclose(np.asarray(losses[k][l]),
                                       np.asarray(ref[k]), rtol=1e-5, atol=1e-5)

    # single-instance API (the torch module's forward signature)
    single = jax.block_until_ready(
        boxes3d_loss(pred_boxes[0], target_boxes_list,
                     indices_per_instance[0], num_boxes))
    ref0 = boxes3d_loss_ref(pred_boxes[0], target_boxes_list,
                            indices_per_instance[0], num_boxes)
    for k in ('loss_bbox', 'loss_giou', 'loss_rad'):
        np.testing.assert_allclose(np.asarray(single[k]), np.asarray(ref0[k]),
                                   rtol=1e-5, atol=1e-5)

    print("KERNEL_OK")
</pallas_src>

<mosaic_0001>
module attributes {stable_mosaic.version = 11 : i64} {
  func.func @boxes3d_loss_kernel(%arg0: memref<1x1xf32, #tpu.memory_space<smem>>, %arg1: memref<3xi32, #tpu.memory_space<smem>>, %arg2: memref<3x8x128xf32, #tpu.memory_space<vmem>>, %arg3: memref<8x128xf32, #tpu.memory_space<vmem>>, %arg4: memref<3x128x128xbf16, #tpu.memory_space<vmem>>, %arg5: memref<3x128x128xbf16, #tpu.memory_space<vmem>>, %arg6: memref<3x1x128xf32, #tpu.memory_space<vmem>>) attributes {dimension_semantics = [], scalar_prefetch = 0 : i64, scratch_operands = 0 : i64, tpu.core_type = #tpu.core_type<tc>} {
    %c0 = arith.constant 0 : index
    %c0_0 = arith.constant 0 : index
    %0 = memref.load %arg0[%c0, %c0_0] : memref<1x1xf32, #tpu.memory_space<smem>>
    %1 = tpu.iota {dimensions = array<i32: 1>} : vector<1x128xi32>
    %c0_1 = arith.constant 0 : index
    %c0_2 = arith.constant 0 : index
    %2 = vector.load %arg3[%c0_1, %c0_2] : memref<8x128xf32, #tpu.memory_space<vmem>>, vector<8x128xf32>
    %3 = arith.truncf %2 : vector<8x128xf32> to vector<8x128xbf16>
    %4 = arith.extf %3 : vector<8x128xbf16> to vector<8x128xf32>
    %5 = arith.subf %2, %4 : vector<8x128xf32>
    %6 = arith.truncf %5 : vector<8x128xf32> to vector<8x128xbf16>
    %7 = arith.extf %6 : vector<8x128xbf16> to vector<8x128xf32>
    %8 = arith.subf %5, %7 : vector<8x128xf32>
    %9 = arith.truncf %8 : vector<8x128xf32> to vector<8x128xbf16>
    %c0_3 = arith.constant 0 : index
    %c0_4 = arith.constant 0 : index
    %c0_5 = arith.constant 0 : index
    %10 = vector.load %arg2[%c0_3, %c0_4, %c0_5] : memref<3x8x128xf32, #tpu.memory_space<vmem>>, vector<1x8x128xf32>
    %11 = vector.shape_cast %10 : vector<1x8x128xf32> to vector<8x128xf32>
    %12 = arith.truncf %11 : vector<8x128xf32> to vector<8x128xbf16>
    %13 = arith.extf %12 : vector<8x128xbf16> to vector<8x128xf32>
    %14 = arith.subf %11, %13 : vector<8x128xf32>
    %15 = arith.truncf %14 : vector<8x128xf32> to vector<8x128xbf16>
    %16 = arith.extf %15 : vector<8x128xbf16> to vector<8x128xf32>
    %17 = arith.subf %14, %16 : vector<8x128xf32>
    %18 = arith.truncf %17 : vector<8x128xf32> to vector<8x128xbf16>
    %c0_6 = arith.constant 0 : index
    %c0_7 = arith.constant 0 : index
    %c0_8 = arith.constant 0 : index
    %19 = vector.load %arg4[%c0_6, %c0_7, %c0_8] : memref<3x128x128xbf16, #tpu.memory_space<vmem>>, vector<1x128x128xbf16>
    %20 = vector.shape_cast %19 : vector<1x128x128xbf16> to vector<128x128xbf16>
    %cst = arith.constant dense<0.000000e+00> : vector<8x128xf32>
    %21 = tpu.matmul %12, %20, %cst {dimension_numbers = #tpu.dot_dimension_numbers<[1], [0], [0], [1], [0, 0, 1, 1], [], []>} : vector<8x128xbf16>, vector<128x128xbf16>, vector<8x128xf32> -> vector<8x128xf32>
    %cst_9 = arith.constant dense<0.000000e+00> : vector<8x128xf32>
    %22 = tpu.matmul %15, %20, %cst_9 {dimension_numbers = #tpu.dot_dimension_numbers<[1], [0], [0], [1], [0, 0, 1, 1], [], []>} : vector<8x128xbf16>, vector<128x128xbf16>, vector<8x128xf32> -> vector<8x128xf32>
    %23 = arith.addf %21, %22 : vector<8x128xf32>
    %cst_10 = arith.constant dense<0.000000e+00> : vector<8x128xf32>
    %24 = tpu.matmul %18, %20, %cst_10 {dimension_numbers = #tpu.dot_dimension_numbers<[1], [0], [0], [1], [0, 0, 1, 1], [], []>} : vector<8x128xbf16>, vector<128x128xbf16>, vector<8x128xf32> -> vector<8x128xf32>
    %25 = arith.addf %23, %24 : vector<8x128xf32>
    %c0_11 = arith.constant 0 : index
    %c0_12 = arith.constant 0 : index
    %c0_13 = arith.constant 0 : index
    %26 = vector.load %arg5[%c0_11, %c0_12, %c0_13] : memref<3x128x128xbf16, #tpu.memory_space<vmem>>, vector<1x128x128xbf16>
    %27 = vector.shape_cast %26 : vector<1x128x128xbf16> to vector<128x128xbf16>
    %cst_14 = arith.constant dense<0.000000e+00> : vector<8x128xf32>
    %28 = tpu.matmul %3, %27, %cst_14 {dimension_numbers = #tpu.dot_dimension_numbers<[1], [0], [0], [1], [0, 0, 1, 1], [], []>} : vector<8x128xbf16>, vector<128x128xbf16>, vector<8x128xf32> -> vector<8x128xf32>
    %cst_15 = arith.constant dense<0.000000e+00> : vector<8x128xf32>
    %29 = tpu.matmul %6, %27, %cst_15 {dimension_numbers = #tpu.dot_dimension_numbers<[1], [0], [0], [1], [0, 0, 1, 1], [], []>} : vector<8x128xbf16>, vector<128x128xbf16>, vector<8x128xf32> -> vector<8x128xf32>
    %30 = arith.addf %28, %29 : vector<8x128xf32>
    %cst_16 = arith.constant dense<0.000000e+00> : vector<8x128xf32>
    %31 = tpu.matmul %9, %27, %cst_16 {dimension_numbers = #tpu.dot_dimension_numbers<[1], [0], [0], [1], [0, 0, 1, 1], [], []>} : vector<8x128xbf16>, vector<128x128xbf16>, vector<8x128xf32> -> vector<8x128xf32>
    %32 = arith.addf %30, %31 : vector<8x128xf32>
    %c0_17 = arith.constant 0 : index
    %33 = memref.load %arg1[%c0_17] : memref<3xi32, #tpu.memory_space<smem>>
    %34 = vector.broadcast %33 : i32 to vector<1x128xi32>
    %35 = arith.cmpi slt, %1, %34 : vector<1x128xi32>
    %36 = arith.subf %25, %32 : vector<8x128xf32>
    %37 = math.absf %36 : vector<8x128xf32>
    %cst_18 = arith.constant dense<0.000000e+00> : vector<8xf32>
    %38 = vector.multi_reduction <add>, %37, %cst_18 [1] : vector<8x128xf32> to vector<8xf32>
    %39 = vector.shape_cast %38 : vector<8xf32> to vector<8x1xf32>
    %40 = vector.extract_strided_slice %39 {offsets = [0, 0], sizes = [6, 1], strides = [1, 1]} : vector<8x1xf32> to vector<6x1xf32>
    %41 = vector.shape_cast %40 : vector<6x1xf32> to vector<1x6x1xf32>
    %cst_19 = arith.constant dense<0.000000e+00> : vector<1xf32>
    %42 = vector.multi_reduction <add>, %41, %cst_19 [1, 2] : vector<1x6x1xf32> to vector<1xf32>
    %43 = vector.shape_cast %42 : vector<1xf32> to vector<1x1x1xf32>
    %44 = vector.extract %43[0, 0, 0] : f32 from vector<1x1x1xf32>
    %45 = vector.broadcast %44 : f32 to vector<1x1xf32>
    %46 = vector.extract_strided_slice %39 {offsets = [6, 0], sizes = [2, 1], strides = [1, 1]} : vector<8x1xf32> to vector<2x1xf32>
    %47 = vector.shape_cast %46 : vector<2x1xf32> to vector<1x2x1xf32>
    %cst_20 = arith.constant dense<0.000000e+00> : vector<1xf32>
    %48 = vector.multi_reduction <add>, %47, %cst_20 [1, 2] : vector<1x2x1xf32> to vector<1xf32>
    %49 = vector.shape_cast %48 : vector<1xf32> to vector<1x1x1xf32>
    %50 = vector.extract %49[0, 0, 0] : f32 from vector<1x1x1xf32>
    %51 = vector.broadcast %50 : f32 to vector<1x1xf32>
    %52 = vector.extract_strided_slice %25 {offsets = [0, 0], sizes = [3, 128], strides = [1, 1]} : vector<8x128xf32> to vector<3x128xf32>
    %53 = vector.extract_strided_slice %25 {offsets = [3, 0], sizes = [3, 128], strides = [1, 1]} : vector<8x128xf32> to vector<3x128xf32>
    %cst_21 = arith.constant 5.000000e-01 : f32
    %54 = vector.broadcast %cst_21 : f32 to vector<3x128xf32>
    %55 = arith.mulf %54, %53 : vector<3x128xf32>
    %56 = arith.subf %52, %55 : vector<3x128xf32>
    %57 = vector.extract_strided_slice %25 {offsets = [0, 0], sizes = [3, 128], strides = [1, 1]} : vector<8x128xf32> to vector<3x128xf32>
    %58 = vector.extract_strided_slice %25 {offsets = [3, 0], sizes = [3, 128], strides = [1, 1]} : vector<8x128xf32> to vector<3x128xf32>
    %cst_22 = arith.constant 5.000000e-01 : f32
    %59 = vector.broadcast %cst_22 : f32 to vector<3x128xf32>
    %60 = arith.mulf %59, %58 : vector<3x128xf32>
    %61 = arith.addf %57, %60 : vector<3x128xf32>
    %62 = vector.extract_strided_slice %32 {offsets = [0, 0], sizes = [3, 128], strides = [1, 1]} : vector<8x128xf32> to vector<3x128xf32>
    %63 = vector.extract_strided_slice %32 {offsets = [3, 0], sizes = [3, 128], strides = [1, 1]} : vector<8x128xf32> to vector<3x128xf32>
    %cst_23 = arith.constant 5.000000e-01 : f32
    %64 = vector.broadcast %cst_23 : f32 to vector<3x128xf32>
    %65 = arith.mulf %64, %63 : vector<3x128xf32>
    %66 = arith.subf %62, %65 : vector<3x128xf32>
    %67 = vector.extract_strided_slice %32 {offsets = [0, 0], sizes = [3, 128], strides = [1, 1]} : vector<8x128xf32> to vector<3x128xf32>
    %68 = vector.extract_strided_slice %32 {offsets = [3, 0], sizes = [3, 128], strides = [1, 1]} : vector<8x128xf32> to vector<3x128xf32>
    %cst_24 = arith.constant 5.000000e-01 : f32
    %69 = vector.broadcast %cst_24 : f32 to vector<3x128xf32>
    %70 = arith.mulf %69, %68 : vector<3x128xf32>
    %71 = arith.addf %67, %70 : vector<3x128xf32>
    %72 = arith.minimumf %61, %71 : vector<3x128xf32>
    %73 = arith.maximumf %56, %66 : vector<3x128xf32>
    %74 = arith.subf %72, %73 : vector<3x128xf32>
    %cst_25 = arith.constant 0.000000e+00 : f32
    %75 = vector.broadcast %cst_25 : f32 to vector<3x128xf32>
    %76 = arith.maximumf %74, %75 : vector<3x128xf32>
    %77 = arith.maximumf %61, %71 : vector<3x128xf32>
    %78 = arith.minimumf %56, %66 : vector<3x128xf32>
    %79 = arith.subf %77, %78 : vector<3x128xf32>
    %cst_26 = arith.constant 0.000000e+00 : f32
    %80 = vector.broadcast %cst_26 : f32 to vector<3x128xf32>
    %81 = arith.maximumf %79, %80 : vector<3x128xf32>
    %82 = arith.subf %61, %56 : vector<3x128xf32>
    %83 = vector.extract_strided_slice %82 {offsets = [0, 0], sizes = [1, 128], strides = [1, 1]} : vector<3x128xf32> to vector<1x128xf32>
    %84 = vector.extract_strided_slice %82 {offsets = [1, 0], sizes = [1, 128], strides = [1, 1]} : vector<3x128xf32> to vector<1x128xf32>
    %85 = arith.mulf %83, %84 : vector<1x128xf32>
    %86 = vector.extract_strided_slice %82 {offsets = [2, 0], sizes = [1, 128], strides = [1, 1]} : vector<3x128xf32> to vector<1x128xf32>
    %87 = arith.mulf %85, %86 : vector<1x128xf32>
    %88 = arith.subf %71, %66 : vector<3x128xf32>
    %89 = vector.extract_strided_slice %88 {offsets = [0, 0], sizes = [1, 128], strides = [1, 1]} : vector<3x128xf32> to vector<1x128xf32>
    %90 = vector.extract_strided_slice %88 {offsets = [1, 0], sizes = [1, 128], strides = [1, 1]} : vector<3x128xf32> to vector<1x128xf32>
    %91 = arith.mulf %89, %90 : vector<1x128xf32>
    %92 = vector.extract_strided_slice %88 {offsets = [2, 0], sizes = [1, 128], strides = [1, 1]} : vector<3x128xf32> to vector<1x128xf32>
    %93 = arith.mulf %91, %92 : vector<1x128xf32>
    %94 = vector.extract_strided_slice %76 {offsets = [0, 0], sizes = [1, 128], strides = [1, 1]} : vector<3x128xf32> to vector<1x128xf32>
    %95 = vector.extract_strided_slice %76 {offsets = [1, 0], sizes = [1, 128], strides = [1, 1]} : vector<3x128xf32> to vector<1x128xf32>
    %96 = arith.mulf %94, %95 : vector<1x128xf32>
    %97 = vector.extract_strided_slice %76 {offsets = [2, 0], sizes = [1, 128], strides = [1, 1]} : vector<3x128xf32> to vector<1x128xf32>
    %98 = arith.mulf %96, %97 : vector<1x128xf32>
    %99 = vector.extract_strided_slice %81 {offsets = [0, 0], sizes = [1, 128], strides = [1, 1]} : vector<3x128xf32> to vector<1x128xf32>
    %100 = vector.extract_strided_slice %81 {offsets = [1, 0], sizes = [1, 128], strides = [1, 1]} : vector<3x128xf32> to vector<1x128xf32>
    %101 = arith.mulf %99, %100 : vector<1x128xf32>
    %102 = vector.extract_strided_slice %81 {offsets = [2, 0], sizes = [1, 128], strides = [1, 1]} : vector<3x128xf32> to vector<1x128xf32>
    %103 = arith.mulf %101, %102 : vector<1x128xf32>
    %104 = arith.addf %87, %93 : vector<1x128xf32>
    %105 = arith.subf %104, %98 : vector<1x128xf32>
    %cst_27 = arith.constant 1.000000e+00 : f32
    %106 = vector.broadcast %cst_27 : f32 to vector<1x128xf32>
    %107 = arith.select %35, %105, %106 : vector<1x128xi1>, vector<1x128xf32>
    %cst_28 = arith.constant 1.000000e+00 : f32
    %108 = vector.broadcast %cst_28 : f32 to vector<1x128xf32>
    %109 = arith.select %35, %103, %108 : vector<1x128xi1>, vector<1x128xf32>
    %110 = arith.divf %98, %107 : vector<1x128xf32>
    %111 = arith.subf %109, %107 : vector<1x128xf32>
    %112 = arith.divf %111, %109 : vector<1x128xf32>
    %113 = arith.subf %110, %112 : vector<1x128xf32>
    %cst_29 = arith.constant 1.000000e+00 : f32
    %114 = vector.broadcast %cst_29 : f32 to vector<1x128xf32>
    %115 = arith.subf %114, %113 : vector<1x128xf32>
    %cst_30 = arith.constant 0.000000e+00 : f32
    %116 = vector.broadcast %cst_30 : f32 to vector<1x128xf32>
    %117 = arith.select %35, %115, %116 : vector<1x128xi1>, vector<1x128xf32>
    %118 = vector.shape_cast %117 : vector<1x128xf32> to vector<1x1x128xf32>
    %cst_31 = arith.constant dense<0.000000e+00> : vector<1xf32>
    %119 = vector.multi_reduction <add>, %118, %cst_31 [1, 2] : vector<1x1x128xf32> to vector<1xf32>
    %120 = vector.shape_cast %119 : vector<1xf32> to vector<1x1x1xf32>
    %121 = vector.extract %120[0, 0, 0] : f32 from vector<1x1x1xf32>
    %122 = vector.broadcast %121 : f32 to vector<1x1xf32>
    %c0_i32 = arith.constant 0 : i32
    %123 = vector.broadcast %c0_i32 : i32 to vector<1x128xi32>
    %124 = arith.cmpi eq, %1, %123 : vector<1x128xi32>
    %125 = vector.broadcast %0 : f32 to vector<1x1xf32>
    %126 = arith.mulf %45, %125 : vector<1x1xf32>
    %c1_i32 = arith.constant 1 : i32
    %127 = vector.broadcast %c1_i32 : i32 to vector<1x128xi32>
    %128 = arith.cmpi eq, %1, %127 : vector<1x128xi32>
    %129 = vector.broadcast %0 : f32 to vector<1x1xf32>
    %130 = arith.mulf %122, %129 : vector<1x1xf32>
    %c2_i32 = arith.constant 2 : i32
    %131 = vector.broadcast %c2_i32 : i32 to vector<1x128xi32>
    %132 = arith.cmpi eq, %1, %131 : vector<1x128xi32>
    %133 = vector.broadcast %0 : f32 to vector<1x1xf32>
    %134 = arith.mulf %51, %133 : vector<1x1xf32>
    %cst_32 = arith.constant 0.000000e+00 : f32
    %135 = vector.shape_cast %134 : vector<1x1xf32> to vector<1x1xf32>
    %136 = vector.broadcast %135 : vector<1x1xf32> to vector<1x128xf32>
    %137 = vector.broadcast %cst_32 : f32 to vector<1x128xf32>
    %138 = arith.select %132, %136, %137 : vector<1x128xi1>, vector<1x128xf32>
    %139 = vector.shape_cast %130 : vector<1x1xf32> to vector<1x1xf32>
    %140 = vector.broadcast %139 : vector<1x1xf32> to vector<1x128xf32>
    %141 = arith.select %128, %140, %138 : vector<1x128xi1>, vector<1x128xf32>
    %142 = vector.shape_cast %126 : vector<1x1xf32> to vector<1x1xf32>
    %143 = vector.broadcast %142 : vector<1x1xf32> to vector<1x128xf32>
    %144 = arith.select %124, %143, %141 : vector<1x128xi1>, vector<1x128xf32>
    %c0_33 = arith.constant 0 : index
    %c0_34 = arith.constant 0 : index
    %c0_35 = arith.constant 0 : index
    %145 = vector.load %arg6[%c0_33, %c0_34, %c0_35] : memref<3x1x128xf32, #tpu.memory_space<vmem>>, vector<1x1x128xf32>
    %146 = vector.shape_cast %145 : vector<1x1x128xf32> to vector<1x128xf32>
    %147 = vector.shape_cast %144 : vector<1x128xf32> to vector<1x1x128xf32>
    tpu.vector_store %arg6[%c0_33, %c0_34, %c0_35], %147 {strides = array<i32>} : memref<3x1x128xf32, #tpu.memory_space<vmem>>, vector<1x1x128xf32>,
    %c1 = arith.constant 1 : index
    %c0_36 = arith.constant 0 : index
    %c0_37 = arith.constant 0 : index
    %148 = vector.load %arg2[%c1, %c0_36, %c0_37] : memref<3x8x128xf32, #tpu.memory_space<vmem>>, vector<1x8x128xf32>
    %149 = vector.shape_cast %148 : vector<1x8x128xf32> to vector<8x128xf32>
    %150 = arith.truncf %149 : vector<8x128xf32> to vector<8x128xbf16>
    %151 = arith.extf %150 : vector<8x128xbf16> to vector<8x128xf32>
    %152 = arith.subf %149, %151 : vector<8x128xf32>
    %153 = arith.truncf %152 : vector<8x128xf32> to vector<8x128xbf16>
    %154 = arith.extf %153 : vector<8x128xbf16> to vector<8x128xf32>
    %155 = arith.subf %152, %154 : vector<8x128xf32>
    %156 = arith.truncf %155 : vector<8x128xf32> to vector<8x128xbf16>
    %c1_38 = arith.constant 1 : index
    %c0_39 = arith.constant 0 : index
    %c0_40 = arith.constant 0 : index
    %157 = vector.load %arg4[%c1_38, %c0_39, %c0_40] : memref<3x128x128xbf16, #tpu.memory_space<vmem>>, vector<1x128x128xbf16>
    %158 = vector.shape_cast %157 : vector<1x128x128xbf16> to vector<128x128xbf16>
    %cst_41 = arith.constant dense<0.000000e+00> : vector<8x128xf32>
    %159 = tpu.matmul %150, %158, %cst_41 {dimension_numbers = #tpu.dot_dimension_numbers<[1], [0], [0], [1], [0, 0, 1, 1], [], []>} : vector<8x128xbf16>, vector<128x128xbf16>, vector<8x128xf32> -> vector<8x128xf32>
    %cst_42 = arith.constant dense<0.000000e+00> : vector<8x128xf32>
    %160 = tpu.matmul %153, %158, %cst_42 {dimension_numbers = #tpu.dot_dimension_numbers<[1], [0], [0], [1], [0, 0, 1, 1], [], []>} : vector<8x128xbf16>, vector<128x128xbf16>, vector<8x128xf32> -> vector<8x128xf32>
    %161 = arith.addf %159, %160 : vector<8x128xf32>
    %cst_43 = arith.constant dense<0.000000e+00> : vector<8x128xf32>
    %162 = tpu.matmul %156, %158, %cst_43 {dimension_numbers = #tpu.dot_dimension_numbers<[1], [0], [0], [1], [0, 0, 1, 1], [], []>} : vector<8x128xbf16>, vector<128x128xbf16>, vector<8x128xf32> -> vector<8x128xf32>
    %163 = arith.addf %161, %162 : vector<8x128xf32>
    %c1_44 = arith.constant 1 : index
    %c0_45 = arith.constant 0 : index
    %c0_46 = arith.constant 0 : index
    %164 = vector.load %arg5[%c1_44, %c0_45, %c0_46] : memref<3x128x128xbf16, #tpu.memory_space<vmem>>, vector<1x128x128xbf16>
    %165 = vector.shape_cast %164 : vector<1x128x128xbf16> to vector<128x128xbf16>
    %cst_47 = arith.constant dense<0.000000e+00> : vector<8x128xf32>
    %166 = tpu.matmul %3, %165, %cst_47 {dimension_numbers = #tpu.dot_dimension_numbers<[1], [0], [0], [1], [0, 0, 1, 1], [], []>} : vector<8x128xbf16>, vector<128x128xbf16>, vector<8x128xf32> -> vector<8x128xf32>
    %cst_48 = arith.constant dense<0.000000e+00> : vector<8x128xf32>
    %167 = tpu.matmul %6, %165, %cst_48 {dimension_numbers = #tpu.dot_dimension_numbers<[1], [0], [0], [1], [0, 0, 1, 1], [], []>} : vector<8x128xbf16>, vector<128x128xbf16>, vector<8x128xf32> -> vector<8x128xf32>
    %168 = arith.addf %166, %167 : vector<8x128xf32>
    %cst_49 = arith.constant dense<0.000000e+00> : vector<8x128xf32>
    %169 = tpu.matmul %9, %165, %cst_49 {dimension_numbers = #tpu.dot_dimension_numbers<[1], [0], [0], [1], [0, 0, 1, 1], [], []>} : vector<8x128xbf16>, vector<128x128xbf16>, vector<8x128xf32> -> vector<8x128xf32>
    %170 = arith.addf %168, %169 : vector<8x128xf32>
    %c1_50 = arith.constant 1 : index
    %171 = memref.load %arg1[%c1_50] : memref<3xi32, #tpu.memory_space<smem>>
    %172 = vector.broadcast %171 : i32 to vector<1x128xi32>
    %173 = arith.cmpi slt, %1, %172 : vector<1x128xi32>
    %174 = arith.subf %163, %170 : vector<8x128xf32>
    %175 = math.absf %174 : vector<8x128xf32>
    %cst_51 = arith.constant dense<0.000000e+00> : vector<8xf32>
    %176 = vector.multi_reduction <add>, %175, %cst_51 [1] : vector<8x128xf32> to vector<8xf32>
    %177 = vector.shape_cast %176 : vector<8xf32> to vector<8x1xf32>
    %178 = vector.extract_strided_slice %177 {offsets = [0, 0], sizes = [6, 1], strides = [1, 1]} : vector<8x1xf32> to vector<6x1xf32>
    %179 = vector.shape_cast %178 : vector<6x1xf32> to vector<1x6x1xf32>
    %cst_52 = arith.constant dense<0.000000e+00> : vector<1xf32>
    %180 = vector.multi_reduction <add>, %179, %cst_52 [1, 2] : vector<1x6x1xf32> to vector<1xf32>
    %181 = vector.shape_cast %180 : vector<1xf32> to vector<1x1x1xf32>
    %182 = vector.extract %181[0, 0, 0] : f32 from vector<1x1x1xf32>
    %183 = vector.broadcast %182 : f32 to vector<1x1xf32>
    %184 = vector.extract_strided_slice %177 {offsets = [6, 0], sizes = [2, 1], strides = [1, 1]} : vector<8x1xf32> to vector<2x1xf32>
    %185 = vector.shape_cast %184 : vector<2x1xf32> to vector<1x2x1xf32>
    %cst_53 = arith.constant dense<0.000000e+00> : vector<1xf32>
    %186 = vector.multi_reduction <add>, %185, %cst_53 [1, 2] : vector<1x2x1xf32> to vector<1xf32>
    %187 = vector.shape_cast %186 : vector<1xf32> to vector<1x1x1xf32>
    %188 = vector.extract %187[0, 0, 0] : f32 from vector<1x1x1xf32>
    %189 = vector.broadcast %188 : f32 to vector<1x1xf32>
    %190 = vector.extract_strided_slice %163 {offsets = [0, 0], sizes = [3, 128], strides = [1, 1]} : vector<8x128xf32> to vector<3x128xf32>
    %191 = vector.extract_strided_slice %163 {offsets = [3, 0], sizes = [3, 128], strides = [1, 1]} : vector<8x128xf32> to vector<3x128xf32>
    %cst_54 = arith.constant 5.000000e-01 : f32
    %192 = vector.broadcast %cst_54 : f32 to vector<3x128xf32>
    %193 = arith.mulf %192, %191 : vector<3x128xf32>
    %194 = arith.subf %190, %193 : vector<3x128xf32>
    %195 = vector.extract_strided_slice %163 {offsets = [0, 0], sizes = [3, 128], strides = [1, 1]} : vector<8x128xf32> to vector<3x128xf32>
    %196 = vector.extract_strided_slice %163 {offsets = [3, 0], sizes = [3, 128], strides = [1, 1]} : vector<8x128xf32> to vector<3x128xf32>
    %cst_55 = arith.constant 5.000000e-01 : f32
    %197 = vector.broadcast %cst_55 : f32 to vector<3x128xf32>
    %198 = arith.mulf %197, %196 : vector<3x128xf32>
    %199 = arith.addf %195, %198 : vector<3x128xf32>
    %200 = vector.extract_strided_slice %170 {offsets = [0, 0], sizes = [3, 128], strides = [1, 1]} : vector<8x128xf32> to vector<3x128xf32>
    %201 = vector.extract_strided_slice %170 {offsets = [3, 0], sizes = [3, 128], strides = [1, 1]} : vector<8x128xf32> to vector<3x128xf32>
    %cst_56 = arith.constant 5.000000e-01 : f32
    %202 = vector.broadcast %cst_56 : f32 to vector<3x128xf32>
    %203 = arith.mulf %202, %201 : vector<3x128xf32>
    %204 = arith.subf %200, %203 : vector<3x128xf32>
    %205 = vector.extract_strided_slice %170 {offsets = [0, 0], sizes = [3, 128], strides = [1, 1]} : vector<8x128xf32> to vector<3x128xf32>
    %206 = vector.extract_strided_slice %170 {offsets = [3, 0], sizes = [3, 128], strides = [1, 1]} : vector<8x128xf32> to vector<3x128xf32>
    %cst_57 = arith.constant 5.000000e-01 : f32
    %207 = vector.broadcast %cst_57 : f32 to vector<3x128xf32>
    %208 = arith.mulf %207, %206 : vector<3x128xf32>
    %209 = arith.addf %205, %208 : vector<3x128xf32>
    %210 = arith.minimumf %199, %209 : vector<3x128xf32>
    %211 = arith.maximumf %194, %204 : vector<3x128xf32>
    %212 = arith.subf %210, %211 : vector<3x128xf32>
    %cst_58 = arith.constant 0.000000e+00 : f32
    %213 = vector.broadcast %cst_58 : f32 to vector<3x128xf32>
    %214 = arith.maximumf %212, %213 : vector<3x128xf32>
    %215 = arith.maximumf %199, %209 : vector<3x128xf32>
    %216 = arith.minimumf %194, %204 : vector<3x128xf32>
    %217 = arith.subf %215, %216 : vector<3x128xf32>
    %cst_59 = arith.constant 0.000000e+00 : f32
    %218 = vector.broadcast %cst_59 : f32 to vector<3x128xf32>
    %219 = arith.maximumf %217, %218 : vector<3x128xf32>
    %220 = arith.subf %199, %194 : vector<3x128xf32>
    %221 = vector.extract_strided_slice %220 {offsets = [0, 0], sizes = [1, 128], strides = [1, 1]} : vector<3x128xf32> to vector<1x128xf32>
    %222 = vector.extract_strided_slice %220 {offsets = [1, 0], sizes = [1, 128], strides = [1, 1]} : vector<3x128xf32> to vector<1x128xf32>
    %223 = arith.mulf %221, %222 : vector<1x128xf32>
    %224 = vector.extract_strided_slice %220 {offsets = [2, 0], sizes = [1, 128], strides = [1, 1]} : vector<3x128xf32> to vector<1x128xf32>
    %225 = arith.mulf %223, %224 : vector<1x128xf32>
    %226 = arith.subf %209, %204 : vector<3x128xf32>
    %227 = vector.extract_strided_slice %226 {offsets = [0, 0], sizes = [1, 128], strides = [1, 1]} : vector<3x128xf32> to vector<1x128xf32>
    %228 = vector.extract_strided_slice %226 {offsets = [1, 0], sizes = [1, 128], strides = [1, 1]} : vector<3x128xf32> to vector<1x128xf32>
    %229 = arith.mulf %227, %228 : vector<1x128xf32>
    %230 = vector.extract_strided_slice %226 {offsets = [2, 0], sizes = [1, 128], strides = [1, 1]} : vector<3x128xf32> to vector<1x128xf32>
    %231 = arith.mulf %229, %230 : vector<1x128xf32>
    %232 = vector.extract_strided_slice %214 {offsets = [0, 0], sizes = [1, 128], strides = [1, 1]} : vector<3x128xf32> to vector<1x128xf32>
    %233 = vector.extract_strided_slice %214 {offsets = [1, 0], sizes = [1, 128], strides = [1, 1]} : vector<3x128xf32> to vector<1x128xf32>
    %234 = arith.mulf %232, %233 : vector<1x128xf32>
    %235 = vector.extract_strided_slice %214 {offsets = [2, 0], sizes = [1, 128], strides = [1, 1]} : vector<3x128xf32> to vector<1x128xf32>
    %236 = arith.mulf %234, %235 : vector<1x128xf32>
    %237 = vector.extract_strided_slice %219 {offsets = [0, 0], sizes = [1, 128], strides = [1, 1]} : vector<3x128xf32> to vector<1x128xf32>
    %238 = vector.extract_strided_slice %219 {offsets = [1, 0], sizes = [1, 128], strides = [1, 1]} : vector<3x128xf32> to vector<1x128xf32>
    %239 = arith.mulf %237, %238 : vector<1x128xf32>
    %240 = vector.extract_strided_slice %219 {offsets = [2, 0], sizes = [1, 128], strides = [1, 1]} : vector<3x128xf32> to vector<1x128xf32>
    %241 = arith.mulf %239, %240 : vector<1x128xf32>
    %242 = arith.addf %225, %231 : vector<1x128xf32>
    %243 = arith.subf %242, %236 : vector<1x128xf32>
    %cst_60 = arith.constant 1.000000e+00 : f32
    %244 = vector.broadcast %cst_60 : f32 to vector<1x128xf32>
    %245 = arith.select %173, %243, %244 : vector<1x128xi1>, vector<1x128xf32>
    %cst_61 = arith.constant 1.000000e+00 : f32
    %246 = vector.broadcast %cst_61 : f32 to vector<1x128xf32>
    %247 = arith.select %173, %241, %246 : vector<1x128xi1>, vector<1x128xf32>
    %248 = arith.divf %236, %245 : vector<1x128xf32>
    %249 = arith.subf %247, %245 : vector<1x128xf32>
    %250 = arith.divf %249, %247 : vector<1x128xf32>
    %251 = arith.subf %248, %250 : vector<1x128xf32>
    %cst_62 = arith.constant 1.000000e+00 : f32
    %252 = vector.broadcast %cst_62 : f32 to vector<1x128xf32>
    %253 = arith.subf %252, %251 : vector<1x128xf32>
    %cst_63 = arith.constant 0.000000e+00 : f32
    %254 = vector.broadcast %cst_63 : f32 to vector<1x128xf32>
    %255 = arith.select %173, %253, %254 : vector<1x128xi1>, vector<1x128xf32>
    %256 = vector.shape_cast %255 : vector<1x128xf32> to vector<1x1x128xf32>
    %cst_64 = arith.constant dense<0.000000e+00> : vector<1xf32>
    %257 = vector.multi_reduction <add>, %256, %cst_64 [1, 2] : vector<1x1x128xf32> to vector<1xf32>
    %258 = vector.shape_cast %257 : vector<1xf32> to vector<1x1x1xf32>
    %259 = vector.extract %258[0, 0, 0] : f32 from vector<1x1x1xf32>
    %260 = vector.broadcast %259 : f32 to vector<1x1xf32>
    %c0_i32_65 = arith.constant 0 : i32
    %261 = vector.broadcast %c0_i32_65 : i32 to vector<1x128xi32>
    %262 = arith.cmpi eq, %1, %261 : vector<1x128xi32>
    %263 = vector.broadcast %0 : f32 to vector<1x1xf32>
    %264 = arith.mulf %183, %263 : vector<1x1xf32>
    %c1_i32_66 = arith.constant 1 : i32
    %265 = vector.broadcast %c1_i32_66 : i32 to vector<1x128xi32>
    %266 = arith.cmpi eq, %1, %265 : vector<1x128xi32>
    %267 = vector.broadcast %0 : f32 to vector<1x1xf32>
    %268 = arith.mulf %260, %267 : vector<1x1xf32>
    %c2_i32_67 = arith.constant 2 : i32
    %269 = vector.broadcast %c2_i32_67 : i32 to vector<1x128xi32>
    %270 = arith.cmpi eq, %1, %269 : vector<1x128xi32>
    %271 = vector.broadcast %0 : f32 to vector<1x1xf32>
    %272 = arith.mulf %189, %271 : vector<1x1xf32>
    %cst_68 = arith.constant 0.000000e+00 : f32
    %273 = vector.shape_cast %272 : vector<1x1xf32> to vector<1x1xf32>
    %274 = vector.broadcast %273 : vector<1x1xf32> to vector<1x128xf32>
    %275 = vector.broadcast %cst_68 : f32 to vector<1x128xf32>
    %276 = arith.select %270, %274, %275 : vector<1x128xi1>, vector<1x128xf32>
    %277 = vector.shape_cast %268 : vector<1x1xf32> to vector<1x1xf32>
    %278 = vector.broadcast %277 : vector<1x1xf32> to vector<1x128xf32>
    %279 = arith.select %266, %278, %276 : vector<1x128xi1>, vector<1x128xf32>
    %280 = vector.shape_cast %264 : vector<1x1xf32> to vector<1x1xf32>
    %281 = vector.broadcast %280 : vector<1x1xf32> to vector<1x128xf32>
    %282 = arith.select %262, %281, %279 : vector<1x128xi1>, vector<1x128xf32>
    %c1_69 = arith.constant 1 : index
    %c0_70 = arith.constant 0 : index
    %c0_71 = arith.constant 0 : index
    %283 = vector.load %arg6[%c1_69, %c0_70, %c0_71] : memref<3x1x128xf32, #tpu.memory_space<vmem>>, vector<1x1x128xf32>
    %284 = vector.shape_cast %283 : vector<1x1x128xf32> to vector<1x128xf32>
    %285 = vector.shape_cast %282 : vector<1x128xf32> to vector<1x1x128xf32>
    tpu.vector_store %arg6[%c1_69, %c0_70, %c0_71], %285 {strides = array<i32>} : memref<3x1x128xf32, #tpu.memory_space<vmem>>, vector<1x1x128xf32>,
    %c2 = arith.constant 2 : index
    %c0_72 = arith.constant 0 : index
    %c0_73 = arith.constant 0 : index
    %286 = vector.load %arg2[%c2, %c0_72, %c0_73] : memref<3x8x128xf32, #tpu.memory_space<vmem>>, vector<1x8x128xf32>
    %287 = vector.shape_cast %286 : vector<1x8x128xf32> to vector<8x128xf32>
    %288 = arith.truncf %287 : vector<8x128xf32> to vector<8x128xbf16>
    %289 = arith.extf %288 : vector<8x128xbf16> to vector<8x128xf32>
    %290 = arith.subf %287, %289 : vector<8x128xf32>
    %291 = arith.truncf %290 : vector<8x128xf32> to vector<8x128xbf16>
    %292 = arith.extf %291 : vector<8x128xbf16> to vector<8x128xf32>
    %293 = arith.subf %290, %292 : vector<8x128xf32>
    %294 = arith.truncf %293 : vector<8x128xf32> to vector<8x128xbf16>
    %c2_74 = arith.constant 2 : index
    %c0_75 = arith.constant 0 : index
    %c0_76 = arith.constant 0 : index
    %295 = vector.load %arg4[%c2_74, %c0_75, %c0_76] : memref<3x128x128xbf16, #tpu.memory_space<vmem>>, vector<1x128x128xbf16>
    %296 = vector.shape_cast %295 : vector<1x128x128xbf16> to vector<128x128xbf16>
    %cst_77 = arith.constant dense<0.000000e+00> : vector<8x128xf32>
    %297 = tpu.matmul %288, %296, %cst_77 {dimension_numbers = #tpu.dot_dimension_numbers<[1], [0], [0], [1], [0, 0, 1, 1], [], []>} : vector<8x128xbf16>, vector<128x128xbf16>, vector<8x128xf32> -> vector<8x128xf32>
    %cst_78 = arith.constant dense<0.000000e+00> : vector<8x128xf32>
    %298 = tpu.matmul %291, %296, %cst_78 {dimension_numbers = #tpu.dot_dimension_numbers<[1], [0], [0], [1], [0, 0, 1, 1], [], []>} : vector<8x128xbf16>, vector<128x128xbf16>, vector<8x128xf32> -> vector<8x128xf32>
    %299 = arith.addf %297, %298 : vector<8x128xf32>
    %cst_79 = arith.constant dense<0.000000e+00> : vector<8x128xf32>
    %300 = tpu.matmul %294, %296, %cst_79 {dimension_numbers = #tpu.dot_dimension_numbers<[1], [0], [0], [1], [0, 0, 1, 1], [], []>} : vector<8x128xbf16>, vector<128x128xbf16>, vector<8x128xf32> -> vector<8x128xf32>
    %301 = arith.addf %299, %300 : vector<8x128xf32>
    %c2_80 = arith.constant 2 : index
    %c0_81 = arith.constant 0 : index
    %c0_82 = arith.constant 0 : index
    %302 = vector.load %arg5[%c2_80, %c0_81, %c0_82] : memref<3x128x128xbf16, #tpu.memory_space<vmem>>, vector<1x128x128xbf16>
    %303 = vector.shape_cast %302 : vector<1x128x128xbf16> to vector<128x128xbf16>
    %cst_83 = arith.constant dense<0.000000e+00> : vector<8x128xf32>
    %304 = tpu.matmul %3, %303, %cst_83 {dimension_numbers = #tpu.dot_dimension_numbers<[1], [0], [0], [1], [0, 0, 1, 1], [], []>} : vector<8x128xbf16>, vector<128x128xbf16>, vector<8x128xf32> -> vector<8x128xf32>
    %cst_84 = arith.constant dense<0.000000e+00> : vector<8x128xf32>
    %305 = tpu.matmul %6, %303, %cst_84 {dimension_numbers = #tpu.dot_dimension_numbers<[1], [0], [0], [1], [0, 0, 1, 1], [], []>} : vector<8x128xbf16>, vector<128x128xbf16>, vector<8x128xf32> -> vector<8x128xf32>
    %306 = arith.addf %304, %305 : vector<8x128xf32>
    %cst_85 = arith.constant dense<0.000000e+00> : vector<8x128xf32>
    %307 = tpu.matmul %9, %303, %cst_85 {dimension_numbers = #tpu.dot_dimension_numbers<[1], [0], [0], [1], [0, 0, 1, 1], [], []>} : vector<8x128xbf16>, vector<128x128xbf16>, vector<8x128xf32> -> vector<8x128xf32>
    %308 = arith.addf %306, %307 : vector<8x128xf32>
    %c2_86 = arith.constant 2 : index
    %309 = memref.load %arg1[%c2_86] : memref<3xi32, #tpu.memory_space<smem>>
    %310 = vector.broadcast %309 : i32 to vector<1x128xi32>
    %311 = arith.cmpi slt, %1, %310 : vector<1x128xi32>
    %312 = arith.subf %301, %308 : vector<8x128xf32>
    %313 = math.absf %312 : vector<8x128xf32>
    %cst_87 = arith.constant dense<0.000000e+00> : vector<8xf32>
    %314 = vector.multi_reduction <add>, %313, %cst_87 [1] : vector<8x128xf32> to vector<8xf32>
    %315 = vector.shape_cast %314 : vector<8xf32> to vector<8x1xf32>
    %316 = vector.extract_strided_slice %315 {offsets = [0, 0], sizes = [6, 1], strides = [1, 1]} : vector<8x1xf32> to vector<6x1xf32>
    %317 = vector.shape_cast %316 : vector<6x1xf32> to vector<1x6x1xf32>
    %cst_88 = arith.constant dense<0.000000e+00> : vector<1xf32>
    %318 = vector.multi_reduction <add>, %317, %cst_88 [1, 2] : vector<1x6x1xf32> to vector<1xf32>
    %319 = vector.shape_cast %318 : vector<1xf32> to vector<1x1x1xf32>
    %320 = vector.extract %319[0, 0, 0] : f32 from vector<1x1x1xf32>
    %321 = vector.broadcast %320 : f32 to vector<1x1xf32>
    %322 = vector.extract_strided_slice %315 {offsets = [6, 0], sizes = [2, 1], strides = [1, 1]} : vector<8x1xf32> to vector<2x1xf32>
    %323 = vector.shape_cast %322 : vector<2x1xf32> to vector<1x2x1xf32>
    %cst_89 = arith.constant dense<0.000000e+00> : vector<1xf32>
    %324 = vector.multi_reduction <add>, %323, %cst_89 [1, 2] : vector<1x2x1xf32> to vector<1xf32>
    %325 = vector.shape_cast %324 : vector<1xf32> to vector<1x1x1xf32>
    %326 = vector.extract %325[0, 0, 0] : f32 from vector<1x1x1xf32>
    %327 = vector.broadcast %326 : f32 to vector<1x1xf32>
    %328 = vector.extract_strided_slice %301 {offsets = [0, 0], sizes = [3, 128], strides = [1, 1]} : vector<8x128xf32> to vector<3x128xf32>
    %329 = vector.extract_strided_slice %301 {offsets = [3, 0], sizes = [3, 128], strides = [1, 1]} : vector<8x128xf32> to vector<3x128xf32>
    %cst_90 = arith.constant 5.000000e-01 : f32
    %330 = vector.broadcast %cst_90 : f32 to vector<3x128xf32>
    %331 = arith.mulf %330, %329 : vector<3x128xf32>
    %332 = arith.subf %328, %331 : vector<3x128xf32>
    %333 = vector.extract_strided_slice %301 {offsets = [0, 0], sizes = [3, 128], strides = [1, 1]} : vector<8x128xf32> to vector<3x128xf32>
    %334 = vector.extract_strided_slice %301 {offsets = [3, 0], sizes = [3, 128], strides = [1, 1]} : vector<8x128xf32> to vector<3x128xf32>
    %cst_91 = arith.constant 5.000000e-01 : f32
    %335 = vector.broadcast %cst_91 : f32 to vector<3x128xf32>
    %336 = arith.mulf %335, %334 : vector<3x128xf32>
    %337 = arith.addf %333, %336 : vector<3x128xf32>
    %338 = vector.extract_strided_slice %308 {offsets = [0, 0], sizes = [3, 128], strides = [1, 1]} : vector<8x128xf32> to vector<3x128xf32>
    %339 = vector.extract_strided_slice %308 {offsets = [3, 0], sizes = [3, 128], strides = [1, 1]} : vector<8x128xf32> to vector<3x128xf32>
    %cst_92 = arith.constant 5.000000e-01 : f32
    %340 = vector.broadcast %cst_92 : f32 to vector<3x128xf32>
    %341 = arith.mulf %340, %339 : vector<3x128xf32>
    %342 = arith.subf %338, %341 : vector<3x128xf32>
    %343 = vector.extract_strided_slice %308 {offsets = [0, 0], sizes = [3, 128], strides = [1, 1]} : vector<8x128xf32> to vector<3x128xf32>
    %344 = vector.extract_strided_slice %308 {offsets = [3, 0], sizes = [3, 128], strides = [1, 1]} : vector<8x128xf32> to vector<3x128xf32>
    %cst_93 = arith.constant 5.000000e-01 : f32
    %345 = vector.broadcast %cst_93 : f32 to vector<3x128xf32>
    %346 = arith.mulf %345, %344 : vector<3x128xf32>
    %347 = arith.addf %343, %346 : vector<3x128xf32>
    %348 = arith.minimumf %337, %347 : vector<3x128xf32>
    %349 = arith.maximumf %332, %342 : vector<3x128xf32>
    %350 = arith.subf %348, %349 : vector<3x128xf32>
    %cst_94 = arith.constant 0.000000e+00 : f32
    %351 = vector.broadcast %cst_94 : f32 to vector<3x128xf32>
    %352 = arith.maximumf %350, %351 : vector<3x128xf32>
    %353 = arith.maximumf %337, %347 : vector<3x128xf32>
    %354 = arith.minimumf %332, %342 : vector<3x128xf32>
    %355 = arith.subf %353, %354 : vector<3x128xf32>
    %cst_95 = arith.constant 0.000000e+00 : f32
    %356 = vector.broadcast %cst_95 : f32 to vector<3x128xf32>
    %357 = arith.maximumf %355, %356 : vector<3x128xf32>
    %358 = arith.subf %337, %332 : vector<3x128xf32>
    %359 = vector.extract_strided_slice %358 {offsets = [0, 0], sizes = [1, 128], strides = [1, 1]} : vector<3x128xf32> to vector<1x128xf32>
    %360 = vector.extract_strided_slice %358 {offsets = [1, 0], sizes = [1, 128], strides = [1, 1]} : vector<3x128xf32> to vector<1x128xf32>
    %361 = arith.mulf %359, %360 : vector<1x128xf32>
    %362 = vector.extract_strided_slice %358 {offsets = [2, 0], sizes = [1, 128], strides = [1, 1]} : vector<3x128xf32> to vector<1x128xf32>
    %363 = arith.mulf %361, %362 : vector<1x128xf32>
    %364 = arith.subf %347, %342 : vector<3x128xf32>
    %365 = vector.extract_strided_slice %364 {offsets = [0, 0], sizes = [1, 128], strides = [1, 1]} : vector<3x128xf32> to vector<1x128xf32>
    %366 = vector.extract_strided_slice %364 {offsets = [1, 0], sizes = [1, 128], strides = [1, 1]} : vector<3x128xf32> to vector<1x128xf32>
    %367 = arith.mulf %365, %366 : vector<1x128xf32>
    %368 = vector.extract_strided_slice %364 {offsets = [2, 0], sizes = [1, 128], strides = [1, 1]} : vector<3x128xf32> to vector<1x128xf32>
    %369 = arith.mulf %367, %368 : vector<1x128xf32>
    %370 = vector.extract_strided_slice %352 {offsets = [0, 0], sizes = [1, 128], strides = [1, 1]} : vector<3x128xf32> to vector<1x128xf32>
    %371 = vector.extract_strided_slice %352 {offsets = [1, 0], sizes = [1, 128], strides = [1, 1]} : vector<3x128xf32> to vector<1x128xf32>
    %372 = arith.mulf %370, %371 : vector<1x128xf32>
    %373 = vector.extract_strided_slice %352 {offsets = [2, 0], sizes = [1, 128], strides = [1, 1]} : vector<3x128xf32> to vector<1x128xf32>
    %374 = arith.mulf %372, %373 : vector<1x128xf32>
    %375 = vector.extract_strided_slice %357 {offsets = [0, 0], sizes = [1, 128], strides = [1, 1]} : vector<3x128xf32> to vector<1x128xf32>
    %376 = vector.extract_strided_slice %357 {offsets = [1, 0], sizes = [1, 128], strides = [1, 1]} : vector<3x128xf32> to vector<1x128xf32>
    %377 = arith.mulf %375, %376 : vector<1x128xf32>
    %378 = vector.extract_strided_slice %357 {offsets = [2, 0], sizes = [1, 128], strides = [1, 1]} : vector<3x128xf32> to vector<1x128xf32>
    %379 = arith.mulf %377, %378 : vector<1x128xf32>
    %380 = arith.addf %363, %369 : vector<1x128xf32>
    %381 = arith.subf %380, %374 : vector<1x128xf32>
    %cst_96 = arith.constant 1.000000e+00 : f32
    %382 = vector.broadcast %cst_96 : f32 to vector<1x128xf32>
    %383 = arith.select %311, %381, %382 : vector<1x128xi1>, vector<1x128xf32>
    %cst_97 = arith.constant 1.000000e+00 : f32
    %384 = vector.broadcast %cst_97 : f32 to vector<1x128xf32>
    %385 = arith.select %311, %379, %384 : vector<1x128xi1>, vector<1x128xf32>
    %386 = arith.divf %374, %383 : vector<1x128xf32>
    %387 = arith.subf %385, %383 : vector<1x128xf32>
    %388 = arith.divf %387, %385 : vector<1x128xf32>
    %389 = arith.subf %386, %388 : vector<1x128xf32>
    %cst_98 = arith.constant 1.000000e+00 : f32
    %390 = vector.broadcast %cst_98 : f32 to vector<1x128xf32>
    %391 = arith.subf %390, %389 : vector<1x128xf32>
    %cst_99 = arith.constant 0.000000e+00 : f32
    %392 = vector.broadcast %cst_99 : f32 to vector<1x128xf32>
    %393 = arith.select %311, %391, %392 : vector<1x128xi1>, vector<1x128xf32>
    %394 = vector.shape_cast %393 : vector<1x128xf32> to vector<1x1x128xf32>
    %cst_100 = arith.constant dense<0.000000e+00> : vector<1xf32>
    %395 = vector.multi_reduction <add>, %394, %cst_100 [1, 2] : vector<1x1x128xf32> to vector<1xf32>
    %396 = vector.shape_cast %395 : vector<1xf32> to vector<1x1x1xf32>
    %397 = vector.extract %396[0, 0, 0] : f32 from vector<1x1x1xf32>
    %398 = vector.broadcast %397 : f32 to vector<1x1xf32>
    %c0_i32_101 = arith.constant 0 : i32
    %399 = vector.broadcast %c0_i32_101 : i32 to vector<1x128xi32>
    %400 = arith.cmpi eq, %1, %399 : vector<1x128xi32>
    %401 = vector.broadcast %0 : f32 to vector<1x1xf32>
    %402 = arith.mulf %321, %401 : vector<1x1xf32>
    %c1_i32_102 = arith.constant 1 : i32
    %403 = vector.broadcast %c1_i32_102 : i32 to vector<1x128xi32>
    %404 = arith.cmpi eq, %1, %403 : vector<1x128xi32>
    %405 = vector.broadcast %0 : f32 to vector<1x1xf32>
    %406 = arith.mulf %398, %405 : vector<1x1xf32>
    %c2_i32_103 = arith.constant 2 : i32
    %407 = vector.broadcast %c2_i32_103 : i32 to vector<1x128xi32>
    %408 = arith.cmpi eq, %1, %407 : vector<1x128xi32>
    %409 = vector.broadcast %0 : f32 to vector<1x1xf32>
    %410 = arith.mulf %327, %409 : vector<1x1xf32>
    %cst_104 = arith.constant 0.000000e+00 : f32
    %411 = vector.shape_cast %410 : vector<1x1xf32> to vector<1x1xf32>
    %412 = vector.broadcast %411 : vector<1x1xf32> to vector<1x128xf32>
    %413 = vector.broadcast %cst_104 : f32 to vector<1x128xf32>
    %414 = arith.select %408, %412, %413 : vector<1x128xi1>, vector<1x128xf32>
    %415 = vector.shape_cast %406 : vector<1x1xf32> to vector<1x1xf32>
    %416 = vector.broadcast %415 : vector<1x1xf32> to vector<1x128xf32>
    %417 = arith.select %404, %416, %414 : vector<1x128xi1>, vector<1x128xf32>
    %418 = vector.shape_cast %402 : vector<1x1xf32> to vector<1x1xf32>
    %419 = vector.broadcast %418 : vector<1x1xf32> to vector<1x128xf32>
    %420 = arith.select %400, %419, %417 : vector<1x128xi1>, vector<1x128xf32>
    %c2_105 = arith.constant 2 : index
    %c0_106 = arith.constant 0 : index
    %c0_107 = arith.constant 0 : index
    %421 = vector.load %arg6[%c2_105, %c0_106, %c0_107] : memref<3x1x128xf32, #tpu.memory_space<vmem>>, vector<1x1x128xf32>
    %422 = vector.shape_cast %421 : vector<1x1x128xf32> to vector<1x128xf32>
    %423 = vector.shape_cast %420 : vector<1x128xf32> to vector<1x1x128xf32>
    tpu.vector_store %arg6[%c2_105, %c0_106, %c0_107], %423 {strides = array<i32>} : memref<3x1x128xf32, #tpu.memory_space<vmem>>, vector<1x1x128xf32>,
    return
  }
}

</mosaic_0001>

<bundles_post_ra>
// kernel: tpu_custom_call.1
= control target key start
LH: loop header
LB: loop body
LE: loop exit
PB: predicated region body
PF: predicated region fallthrough
CT: control target
= control target key end

     0   :  { %12 = vsyncpa [#allocation6], 0  ;;  %s2749_s0 = inlined_call_operand.<no memory space> [shape: f32[1,1], index: 0, kind: input, shape index: {}]   ;;  %s2750_s1 = inlined_call_operand.vmem [shape: s32[3], index: 1, kind: input, shape index: {}]   ;;  %s2751_s2 = inlined_call_operand.hbm [shape: f32[3,8,128], index: 2, kind: input, shape index: {}]   ;;  %s2752_s3 = inlined_call_operand.hbm [shape: f32[8,128], index: 3, kind: input, shape index: {}]   ;;  %s2753_s4 = inlined_call_operand.hbm [shape: bf16[3,128,128], index: 4, kind: input, shape index: {}]   ;;  %s2754_s5 = inlined_call_operand.hbm [shape: bf16[3,128,128], index: 5, kind: input, shape index: {}]   ;;  %s2755_s6 = inlined_call_operand.hbm [shape: f32[3,1,128], index: 6, kind: output, shape index: {}]  }
   0x1   :  { %13 = vsyncpa [#allocation4], 0 }
   0x2   :  { %14 = vsyncpa [#allocation9], 0 }
   0x3   :  { %15 = vsyncpa [#allocation12], 0 }
   0x4   :  { %16 = vsyncpa [#allocation5], 0  ;;  %s25_s23 = sshll.u32 %s2750_s1, 4  ;;  %s2394_s24 = smov [#allocation8]   ;;  %s26_s23 = int_to_ptr.vmem [resolvable:$true] %s25_s23 }
   0x5   :  { %s47_s25 = sshll.u32 %s2394_s24, 4  ;;  %s48_s25 = int_to_ptr.vmem [resolvable:$true] %s47_s25 }
   0x6   :  { %s2280_s26 = scalar_lea.vmem %s48_s25, 128  ;;  %p2285_p1 = scmp.lt.s32.totalorder %s48_s25, %s48_s25 }
   0x7   :  { %p2281_p0 = scmp.ne.s32.totalorder %s48_s25, %s2280_s26  ;;  %p2286_p2 = scmp.lt.s32.totalorder %s2280_s26, %s2280_s26 }
   0x9   :  { %p2287_p3 = por %p2286_p2, %p2285_p1 }
   0xb   :  { %p2288_p4 = pnand %p2287_p3, %p2281_p0 }
   0xd   :  { %2291 = shalt.err (!%p2288_p4)
}
   0xe   :  { %50 = dma.hbm_to_vmem [thread:$0]  %s2752_s3, 128, %s48_s25, [#allocation9]  }
   0xf   :  { %s2292_s29 = scalar_lea.vmem %s26_s23, 16  ;;  %p2297_p6 = scmp.lt.s32.totalorder %s26_s23, %s26_s23 }
  0x10   :  { %p2293_p5 = scmp.ne.s32.totalorder %s26_s23, %s2292_s29  ;;  %p2298_p7 = scmp.lt.s32.totalorder %s2292_s29, %s2292_s29 }
  0x12   :  { %p2299_p8 = por %p2298_p7, %p2297_p6 }
  0x14   :  { %p2300_p9 = pnand %p2299_p8, %p2293_p5 }
  0x16   :  { %2303 = shalt.err (!%p2300_p9)
}
  0x17   :  { %s2395_s1 = smov [#allocation3]   ;;  %s2396_s30 = smov [#allocation7]  }
  0x18   :  { %28 = dma.vmem_to_smem %s26_s23, 16, %s2395_s1, [#allocation6]  }
  0x19   :  { %s34_s7 = sshll.u32 %s2396_s30, 4  ;;  %s35_s7 = int_to_ptr.vmem [resolvable:$true] %s34_s7 }
  0x1a   :  { %s2312_s8 = scalar_lea.vmem %s35_s7, 384  ;;  %p2317_p11 = scmp.lt.s32.totalorder %s35_s7, %s35_s7 }
  0x1b   :  { %p2313_p10 = scmp.ne.s32.totalorder %s35_s7, %s2312_s8  ;;  %p2318_p12 = scmp.lt.s32.totalorder %s2312_s8, %s2312_s8 }
  0x1d   :  { %p2319_p13 = por %p2318_p12, %p2317_p11 }
  0x1f   :  { %p2320_p0 = pnand %p2319_p13, %p2313_p10 }
  0x21   :  { %2323 = shalt.err (!%p2320_p0)
}
  0x22   :  { %s2397_s3 = smov 128   ;;  %s2398_s9 = smov 8  }
  0x23   :  { %40 = dma.hbm_to_vmem [thread:$0]  %s2751_s2, 384, %s35_s7, [#allocation4], %s2397_s3, %s2397_s3, %s2398_s9  }
  0x24   :  { %s2399_s12 = smov [#allocation10]  }
  0x25   :  { %s56_s13 = sshll.u32 %s2399_s12, 4  ;;  %s57_s13 = int_to_ptr.vmem [resolvable:$true] %s56_s13 }
  0x26   :  { %s2332_s14 = scalar_lea.vmem %s57_s13, 3072  ;;  %p2337_p2 = scmp.lt.s32.totalorder %s57_s13, %s57_s13 }
  0x27   :  { %p2333_p1 = scmp.ne.s32.totalorder %s57_s13, %s2332_s14  ;;  %p2338_p3 = scmp.lt.s32.totalorder %s2332_s14, %s2332_s14 }
  0x29   :  { %p2339_p4 = por %p2338_p3, %p2337_p2 }
  0x2b   :  { %p2340_p5 = pnand %p2339_p4, %p2333_p1 }
  0x2d   :  { %2343 = shalt.err (!%p2340_p5)
}
  0x2e   :  { %s2400_s15 = smov 64   ;;  %s2401_s16 = smov 4  }
  0x2f   :  { %62 = dma.hbm_to_vmem [thread:$0]  %s2753_s4, 3072, %s57_s13, [#allocation9], %s2400_s15, %s2400_s15, %s2401_s16  }
  0x30   :  { %s2402_s19 = smov [#allocation11]  }
  0x31   :  { %s68_s20 = sshll.u32 %s2402_s19, 4  ;;  %s69_s20 = int_to_ptr.vmem [resolvable:$true] %s68_s20 }
  0x32   :  { %s2352_s2 = scalar_lea.vmem %s69_s20, 3072  ;;  %p2357_p7 = scmp.lt.s32.totalorder %s69_s20, %s69_s20 }
  0x33   :  { %p2353_p6 = scmp.ne.s32.totalorder %s69_s20, %s2352_s2  ;;  %p2358_p8 = scmp.lt.s32.totalorder %s2352_s2, %s2352_s2 }
  0x35   :  { %p2359_p9 = por %p2358_p8, %p2357_p7 }
  0x37   :  { %p2360_p10 = pnand %p2359_p9, %p2353_p6 }
  0x39   :  { %2363 = shalt.err (!%p2360_p10)
}
  0x3a   :  { %74 = dma.hbm_to_vmem [thread:$0]  %s2754_s5, 3072, %s69_s20, [#allocation12], %s2400_s15, %s2400_s15, %s2401_s16  }
  0x3b   :  { %2384 = dma.done.wait [#allocation6], 16  }
  0x3c   :  { %2385 = vsyncadd [#allocation6], 4294967280 }
  0x3d   :  { %2386 = dma.done.wait [#allocation4], 384  }
  0x3e   :  { %2387 = vsyncadd [#allocation4], 4294966912 }
  0x3f   :  { %2388 = dma.done.wait [#allocation9], 3200  }
  0x40   :  { %2389 = vsyncadd [#allocation9], 4294964096 }
  0x41   :  { %2390 = dma.done.wait [#allocation12], 3072  }
  0x42   :  { %2391 = vsyncadd [#allocation12], 4294964224 }
  0x43   :  { %90 = sfence }
  0x44   :  { %v2212_v0 = vld [vmem:[#allocation10 + $0x38] sm:$0xff]   ;;  %v2403_v1 = vmov 0.0   ;;  %v2213_v2 = vld [vmem:[#allocation10 + $0x30] sm:$0xff]   ;;  %vm2404_vm0 = vmmov 0   ;;  %v2214_v3 = vld [vmem:[#allocation10 + $0x28] sm:$0xff]   ;;  %s481_s4 = sld [smem:[#allocation3]] }
  0x45   :  { %1820 = vmatprep.subr.bf16.mxu0 %v2403_v1  ;;  %1840 = vmatprep.subr.bf16.mxu1 %v2403_v1  ;;  %v2215_v4 = vld [vmem:[#allocation10 + $0x20] sm:$0xff]   ;;  %v2216_v5 = vld [vmem:[#allocation10 + $0x18] sm:$0xff]   ;;  %v2217_v8 = vld [vmem:[#allocation10 + $0x10] sm:$0xff]   ;;  %s1640_s5 = sld [smem:[#allocation3 + $0x1]]  ;;  %vm503_vm3 = vcmask 1024   ;;  %vm577_vm4 = vcmask 1040384  }
  0x46   :  { %1821 = vmatpush3.bf16.msra.mxu0 %v2212_v0  ;;  %1841 = vmatpush3.bf16.msra.mxu1 %v2212_v0  ;;  %v103_v6 = vld [vmem:[#allocation7] sm:$0xff]  ;;  %v2218_v10 = vld [vmem:[#allocation10 + $0x8] sm:$0xff]   ;;  %v2220_v14 = vld [vmem:[#allocation11 + $0x38] sm:$0xff]   ;;  %vm488_vm5 = vcmask 5120   ;;  %s1657_s23 = sld [smem:[#allocation3 + $0x2]]  ;;  %s2405_s3 = smov [#allocation13]  }
  0x47   :  { %1822 = vmatprep.subr.bf16.mxu0 %v2403_v1  ;;  %1842 = vmatprep.subr.bf16.mxu1 %v2403_v1  ;;  %v104_v7 = vpack.c.bf16 %v103_v6, %v103_v6  ;;  %v2219_v12 = vld [vmem:[#allocation10] sm:$0xff]   ;;  %v2221_v15 = vld [vmem:[#allocation11 + $0x30] sm:$0xff]   ;;  %v2222_v16 = vld [vmem:[#allocation11 + $0x28] sm:$0xff]   ;;  %s1593_s9 = sshll.u32 %s2405_s3, 4  ;;  %s1594_s9 = int_to_ptr.vmem [resolvable:$true] %s1593_s9 }
  0x48   :  { %1836 = vmatprep.mubr.msk.bf16.mxu0 %vm2404_vm0, %v2403_v1  ;;  %1856 = vmatprep.mubr.msk.bf16.mxu1 %vm2404_vm0, %v2403_v1  ;;  %v2223_v17 = vld [vmem:[#allocation11 + $0x20] sm:$0xff]   ;;  %v2224_v18 = vld [vmem:[#allocation11 + $0x18] sm:$0xff]   ;;  %v2225_v21 = vld [vmem:[#allocation11 + $0x10] sm:$0xff]   ;;  %s2364_s10 = scalar_lea.vmem %s1594_s9, 48  ;;  %s2368_s11 = scalar_lea.vmem %s1594_s9, 64 }
  0x49   :  { %v105_v9 = vunpack.c.l.bf16 %v104_v7  ;;  %v95_v19 = vld [vmem:[#allocation8] sm:$0xff]  ;;  %v2226_v24 = vld [vmem:[#allocation11 + $0x8] sm:$0xff]   ;;  %v2227_v27 = vld [vmem:[#allocation11] sm:$0xff]   ;;  %p2365_p11 = scmp.ne.s32.totalorder %s1594_s9, %s2364_s10  ;;  %p2369_p12 = scmp.lt.s32.totalorder %s1594_s9, %s1594_s9 }
  0x4a   :  { %1823 = vmatpush3.bf16.msra.mxu0 %v2213_v2  ;;  %1843 = vmatpush3.bf16.msra.mxu1 %v2213_v2  ;;  %v2492_v20 = vpack.c.bf16 %v95_v19, %v95_v19  ;;  %v2228_v33 = vld [vmem:[#allocation10 + $0x78] sm:$0xff]   ;;  %v2229_v34 = vld [vmem:[#allocation10 + $0x70] sm:$0xff]   ;;  %v2230_v35 = vld [vmem:[#allocation10 + $0x68] sm:$0xff]   ;;  %p2370_p13 = scmp.lt.s32.totalorder %s2368_s11, %s2364_s10 }
  0x4b   :  { %1824 = vmatprep.subr.bf16.mxu0 %v2403_v1  ;;  %1844 = vmatprep.subr.bf16.mxu1 %v2403_v1  ;;  %v106_v11 = vsub.f32 %v103_v6, %v105_v9  ;;  %v2231_v36 = vld [vmem:[#allocation10 + $0x60] sm:$0xff]   ;;  %v2232_v37 = vld [vmem:[#allocation10 + $0x58] sm:$0xff]   ;;  %v601_v38 = vld [vmem:[#allocation7 + $0x8] sm:$0xff] }
  0x4c   :  { %v97_v23 = vunpack.c.l.bf16 %v2492_v20  ;;  %v602_v39 = vpack.c.bf16 %v601_v38, %v601_v38  ;;  %v2233_v40 = vld [vmem:[#allocation10 + $0x50] sm:$0xff]   ;;  %v2234_v42 = vld [vmem:[#allocation10 + $0x48] sm:$0xff]   ;;  %v2235_v44 = vld [vmem:[#allocation10 + $0x40] sm:$0xff]   ;;  %p2371_p0 = por %p2370_p13, %p2369_p12 }
  0x4d   :  { %v107_v13 = vpack.c.bf16 %v106_v11, %v106_v11  ;;  %v2236_v46 = vld [vmem:[#allocation11 + $0x78] sm:$0xff]   ;;  %v2237_v47 = vld [vmem:[#allocation11 + $0x70] sm:$0xff]   ;;  %v2238_v48 = vld [vmem:[#allocation11 + $0x68] sm:$0xff]  }
  0x4e   :  { %1825 = vmatpush3.bf16.msra.mxu0 %v2214_v3  ;;  %1845 = vmatpush3.bf16.msra.mxu1 %v2214_v3  ;;  %v98_v26 = vsub.f32 %v95_v19, %v97_v23  ;;  %v603_v41 = vunpack.c.l.bf16 %v602_v39  ;;  %v2239_v49 = vld [vmem:[#allocation11 + $0x60] sm:$0xff]   ;;  %v2240_v50 = vld [vmem:[#allocation11 + $0x58] sm:$0xff]   ;;  %v2241_v51 = vld [vmem:[#allocation11 + $0x50] sm:$0xff]   ;;  %p2372_p1 = pnand %p2371_p0, %p2365_p11 }
  0x4f   :  { %1826 = vmatprep.subr.bf16.mxu0 %v2403_v1  ;;  %1846 = vmatprep.subr.bf16.mxu1 %v2403_v1  ;;  %v108_v22 = vunpack.c.l.bf16 %v107_v13  ;;  %v2242_v53 = vld [vmem:[#allocation11 + $0x48] sm:$0xff]   ;;  %v2243_v55 = vld [vmem:[#allocation11 + $0x40] sm:$0xff]   ;;  %v2244_v57 = vld [vmem:[#allocation10 + $0xb8] sm:$0xff]  }
  0x50   :  { %v2501_v29 = vpack.c.bf16 %v98_v26, %v98_v26  ;;  %v604_v43 = vsub.f32 %v601_v38, %v603_v41  ;;  %v2245_v58 = vld [vmem:[#allocation10 + $0xb0] sm:$0xff]   ;;  %v2246_v59 = vld [vmem:[#allocation10 + $0xa8] sm:$0xff]   ;;  %v2247_v60 = vld [vmem:[#allocation10 + $0xa0] sm:$0xff]  }
  0x51   :  { %v109_v25 = vsub.f32 %v106_v11, %v108_v22  ;;  %v2248_v61 = vld [vmem:[#allocation10 + $0x98] sm:$0xff]   ;;  %v1095_v62 = vld [vmem:[#allocation7 + $0x10] sm:$0xff]  ;;  %v2255_v19 = vld [vmem:[#allocation11 + $0xa0] sm:$0xff]  }
  0x52   :  { %1827 = vmatpush3.bf16.msra.mxu0 %v2215_v4  ;;  %1847 = vmatpush3.bf16.msra.mxu1 %v2215_v4  ;;  %v100_v30 = vunpack.c.l.bf16 %v2501_v29  ;;  %v605_v45 = vpack.c.bf16 %v604_v43, %v604_v43  ;;  %v1096_v63 = vpack.c.bf16 %v1095_v62, %v1095_v62  ;;  %v2253_v11 = vld [vmem:[#allocation11 + $0xb0] sm:$0xff]  }
  0x53   :  { %1828 = vmatprep.subr.bf16.mxu0 %v2403_v1  ;;  %1848 = vmatprep.subr.bf16.mxu1 %v2403_v1  ;;  %v110_v28 = vpack.c.bf16 %v109_v25, %v109_v25  ;;  %v2257_v22 = vld [vmem:[#allocation11 + $0x90] sm:$0xff]  }
  0x54   :  { %v101_v31 = vsub.f32 %v98_v26, %v100_v30  ;;  %v606_v52 = vunpack.c.l.bf16 %v605_v45  ;;  %v2259_v26 = vld [vmem:[#allocation11 + $0x80] sm:$0xff]  }
  0x56   :  { %1829 = vmatpush3.bf16.msra.mxu0 %v2216_v5  ;;  %1849 = vmatpush3.bf16.msra.mxu1 %v2216_v5  ;;  %v2525_v32 = vpack.c.bf16 %v101_v31, %v101_v31  ;;  %v607_v54 = vsub.f32 %v604_v43, %v606_v52 }
  0x57   :  { %1830 = vmatprep.subr.bf16.mxu0 %v2403_v1  ;;  %1850 = vmatprep.subr.bf16.mxu1 %v2403_v1 }
  0x58   :  { %v608_v56 = vpack.c.bf16 %v607_v54, %v607_v54 }
  0x5a   :  { %1831 = vmatpush3.bf16.msra.mxu0 %v2217_v8  ;;  %1851 = vmatpush3.bf16.msra.mxu1 %v2217_v8 }
  0x5b   :  { %1832 = vmatprep.subr.bf16.mxu0 %v2403_v1  ;;  %1852 = vmatprep.subr.bf16.mxu1 %v2403_v1 }
  0x5e   :  { %1833 = vmatpush3.bf16.msra.mxu0 %v2218_v10  ;;  %1853 = vmatpush3.bf16.msra.mxu1 %v2218_v10 }
  0x5f   :  { %1834 = vmatprep.subr.bf16.mxu0 %v2403_v1  ;;  %1854 = vmatprep.subr.bf16.mxu1 %v2403_v1 }
  0x62   :  { %1835 = vmatpush3.bf16.msra.mxu0 %v2219_v12  ;;  %1855 = vmatpush3.bf16.msra.mxu1 %v2219_v12 }
  0x63   :  { %1860 = vmatprep.subr.bf16.mxu0 %v2403_v1  ;;  %1880 = vmatprep.subr.bf16.mxu1 %v2403_v1 }
  0x65   :  { %1837 = vmatmul.mubr.bf16.vlgmr.msra.gmra.mxu0 %v107_v13  ;;  %1857 = vmatmul.mubr.bf16.vlgmr.msra.gmra.mxu1 %v104_v7  ;;  %v2252_v7 = vld [vmem:[#allocation11 + $0xb8] sm:$0xff]  }
  0x66   :  { %1861 = vmatpush3.bf16.msra.mxu0 %v2212_v0  ;;  %1881 = vmatpush3.bf16.msra.mxu1 %v2220_v14  ;;  %v2249_v0 = vld [vmem:[#allocation10 + $0x90] sm:$0xff]  }
  0x67   :  { %1862 = vmatprep.subr.bf16.mxu0 %v2403_v1  ;;  %1882 = vmatprep.subr.bf16.mxu1 %v2403_v1 }
  0x68   :  { %1876 = vmatprep.mubr.msk.bf16.mxu0 %vm2404_vm0, %v2403_v1  ;;  %1896 = vmatprep.mubr.msk.bf16.mxu1 %vm2404_vm0, %v2403_v1 }
  0x6a   :  { %1863 = vmatpush3.bf16.msra.mxu0 %v2213_v2  ;;  %1883 = vmatpush3.bf16.msra.mxu1 %v2221_v15  ;;  %v1097_v2 = vunpack.c.l.bf16 %v1096_v63 }
  0x6b   :  { %1864 = vmatprep.subr.bf16.mxu0 %v2403_v1  ;;  %1884 = vmatprep.subr.bf16.mxu1 %v2403_v1 }
  0x6e   :  { %1865 = vmatpush3.bf16.msra.mxu0 %v2214_v3  ;;  %1885 = vmatpush3.bf16.msra.mxu1 %v2222_v16  ;;  %v2250_v3 = vld [vmem:[#allocation10 + $0x88] sm:$0xff]  }
  0x6f   :  { %1866 = vmatprep.subr.bf16.mxu0 %v2403_v1  ;;  %1886 = vmatprep.subr.bf16.mxu1 %v2403_v1 }
  0x72   :  { %1867 = vmatpush3.bf16.msra.mxu0 %v2215_v4  ;;  %1887 = vmatpush3.bf16.msra.mxu1 %v2223_v17  ;;  %v1098_v4 = vsub.f32 %v1095_v62, %v1097_v2  ;;  %v93_v62 = vlaneseq }
  0x73   :  { %1868 = vmatprep.subr.bf16.mxu0 %v2403_v1  ;;  %1888 = vmatprep.subr.bf16.mxu1 %v2403_v1 }
  0x74   :  { %v1099_v6 = vpack.c.bf16 %v1098_v4, %v1098_v4 }
  0x76   :  { %1869 = vmatpush3.bf16.msra.mxu0 %v2216_v5  ;;  %1889 = vmatpush3.bf16.msra.mxu1 %v2224_v18  ;;  %v2251_v5 = vld [vmem:[#allocation10 + $0x80] sm:$0xff]   ;;  %v1100_v23 = vunpack.c.l.bf16 %v1099_v6 }
  0x77   :  { %1870 = vmatprep.subr.bf16.mxu0 %v2403_v1  ;;  %1890 = vmatprep.subr.bf16.mxu1 %v2403_v1 }
  0x78   :  { %v1101_v25 = vsub.f32 %v1098_v4, %v1100_v23 }
  0x7a   :  { %1871 = vmatpush3.bf16.msra.mxu0 %v2217_v8  ;;  %1891 = vmatpush3.bf16.msra.mxu1 %v2225_v21 }
  0x7b   :  { %1872 = vmatprep.subr.bf16.mxu0 %v2403_v1  ;;  %1892 = vmatprep.subr.bf16.mxu1 %v2403_v1 }
  0x7e   :  { %1873 = vmatpush3.bf16.msra.mxu0 %v2218_v10  ;;  %1893 = vmatpush3.bf16.msra.mxu1 %v2226_v24 }
  0x7f   :  { %1874 = vmatprep.subr.bf16.mxu0 %v2403_v1  ;;  %1894 = vmatprep.subr.bf16.mxu1 %v2403_v1 }
  0x82   :  { %1875 = vmatpush3.bf16.msra.mxu0 %v2219_v12  ;;  %1895 = vmatpush3.bf16.msra.mxu1 %v2227_v27 }
  0x83   :  { %1900 = vmatprep.subr.bf16.mxu0 %v2403_v1  ;;  %1920 = vmatprep.subr.bf16.mxu1 %v2403_v1 }
  0x85   :  { %1877 = vmatmul.mubr.bf16.vlgmr.msra.gmra.mxu0 %v110_v28  ;;  %1897 = vmatmul.mubr.bf16.vlgmr.msra.gmra.mxu1 %v2501_v29 }
  0x86   :  { %1901 = vmatpush3.bf16.msra.mxu0 %v2220_v14  ;;  %1921 = vmatpush3.bf16.msra.mxu1 %v2220_v14 }
  0x87   :  { %1902 = vmatprep.subr.bf16.mxu0 %v2403_v1  ;;  %1922 = vmatprep.subr.bf16.mxu1 %v2403_v1 }
  0x88   :  { %1916 = vmatprep.mubr.msk.bf16.mxu0 %vm2404_vm0, %v2403_v1  ;;  %1936 = vmatprep.mubr.msk.bf16.mxu1 %vm2404_vm0, %v2403_v1 }
  0x8a   :  { %1903 = vmatpush3.bf16.msra.mxu0 %v2221_v15  ;;  %1923 = vmatpush3.bf16.msra.mxu1 %v2221_v15 }
  0x8b   :  { %1904 = vmatprep.subr.bf16.mxu0 %v2403_v1  ;;  %1924 = vmatprep.subr.bf16.mxu1 %v2403_v1 }
  0x8e   :  { %1905 = vmatpush3.bf16.msra.mxu0 %v2222_v16  ;;  %1925 = vmatpush3.bf16.msra.mxu1 %v2222_v16  ;;  %v2254_v16 = vld [vmem:[#allocation11 + $0xa8] sm:$0xff]  }
  0x8f   :  { %1906 = vmatprep.subr.bf16.mxu0 %v2403_v1  ;;  %1926 = vmatprep.subr.bf16.mxu1 %v2403_v1 }
  0x92   :  { %1907 = vmatpush3.bf16.msra.mxu0 %v2223_v17  ;;  %1927 = vmatpush3.bf16.msra.mxu1 %v2223_v17 }
  0x93   :  { %1908 = vmatprep.subr.bf16.mxu0 %v2403_v1  ;;  %1928 = vmatprep.subr.bf16.mxu1 %v2403_v1 }
  0x96   :  { %1909 = vmatpush3.bf16.msra.mxu0 %v2224_v18  ;;  %1929 = vmatpush3.bf16.msra.mxu1 %v2224_v18 }
  0x97   :  { %1910 = vmatprep.subr.bf16.mxu0 %v2403_v1  ;;  %1930 = vmatprep.subr.bf16.mxu1 %v2403_v1 }
  0x9a   :  { %1911 = vmatpush3.bf16.msra.mxu0 %v2225_v21  ;;  %1931 = vmatpush3.bf16.msra.mxu1 %v2225_v21  ;;  %v2256_v21 = vld [vmem:[#allocation11 + $0x98] sm:$0xff]  }
  0x9b   :  { %1912 = vmatprep.subr.bf16.mxu0 %v2403_v1  ;;  %1932 = vmatprep.subr.bf16.mxu1 %v2403_v1 }
  0x9e   :  { %1913 = vmatpush3.bf16.msra.mxu0 %v2226_v24  ;;  %1933 = vmatpush3.bf16.msra.mxu1 %v2226_v24  ;;  %v2258_v24 = vld [vmem:[#allocation11 + $0x88] sm:$0xff]  }
  0x9f   :  { %1914 = vmatprep.subr.bf16.mxu0 %v2403_v1  ;;  %1934 = vmatprep.subr.bf16.mxu1 %v2403_v1 }
  0xa2   :  { %1915 = vmatpush3.bf16.msra.mxu0 %v2227_v27  ;;  %1935 = vmatpush3.bf16.msra.mxu1 %v2227_v27  ;;  %v1102_v27 = vpack.c.bf16 %v1101_v25, %v1101_v25 }
  0xa3   :  { %1940 = vmatprep.subr.bf16.mxu0 %v2403_v1  ;;  %1960 = vmatprep.subr.bf16.mxu1 %v2403_v1 }
  0xa5   :  { %1917 = vmatmul.mubr.bf16.vlgmr.msra.gmra.mxu0 %v2492_v20  ;;  %1937 = vmatmul.mubr.bf16.vlgmr.msra.gmra.mxu1 %v2525_v32 }
  0xa6   :  { %1941 = vmatpush3.bf16.msra.mxu0 %v2228_v33  ;;  %1961 = vmatpush3.bf16.msra.mxu1 %v2228_v33 }
  0xa7   :  { %1942 = vmatprep.subr.bf16.mxu0 %v2403_v1  ;;  %1962 = vmatprep.subr.bf16.mxu1 %v2403_v1 }
  0xa8   :  { %1956 = vmatprep.mubr.msk.bf16.mxu0 %vm2404_vm0, %v2403_v1  ;;  %1976 = vmatprep.mubr.msk.bf16.mxu1 %vm2404_vm0, %v2403_v1 }
  0xaa   :  { %1943 = vmatpush3.bf16.msra.mxu0 %v2229_v34  ;;  %1963 = vmatpush3.bf16.msra.mxu1 %v2229_v34 }
  0xab   :  { %1944 = vmatprep.subr.bf16.mxu0 %v2403_v1  ;;  %1964 = vmatprep.subr.bf16.mxu1 %v2403_v1 }
  0xae   :  { %1945 = vmatpush3.bf16.msra.mxu0 %v2230_v35  ;;  %1965 = vmatpush3.bf16.msra.mxu1 %v2230_v35 }
  0xaf   :  { %1946 = vmatprep.subr.bf16.mxu0 %v2403_v1  ;;  %1966 = vmatprep.subr.bf16.mxu1 %v2403_v1 }
  0xb2   :  { %1947 = vmatpush3.bf16.msra.mxu0 %v2231_v36  ;;  %1967 = vmatpush3.bf16.msra.mxu1 %v2231_v36 }
  0xb3   :  { %1948 = vmatprep.subr.bf16.mxu0 %v2403_v1  ;;  %1968 = vmatprep.subr.bf16.mxu1 %v2403_v1 }
  0xb6   :  { %1949 = vmatpush3.bf16.msra.mxu0 %v2232_v37  ;;  %1969 = vmatpush3.bf16.msra.mxu1 %v2232_v37 }
  0xb7   :  { %1950 = vmatprep.subr.bf16.mxu0 %v2403_v1  ;;  %1970 = vmatprep.subr.bf16.mxu1 %v2403_v1 }
  0xba   :  { %1951 = vmatpush3.bf16.msra.mxu0 %v2233_v40  ;;  %1971 = vmatpush3.bf16.msra.mxu1 %v2233_v40 }
  0xbb   :  { %1952 = vmatprep.subr.bf16.mxu0 %v2403_v1  ;;  %1972 = vmatprep.subr.bf16.mxu1 %v2403_v1 }
  0xbe   :  { %1953 = vmatpush3.bf16.msra.mxu0 %v2234_v42  ;;  %1973 = vmatpush3.bf16.msra.mxu1 %v2234_v42 }
  0xbf   :  { %1954 = vmatprep.subr.bf16.mxu0 %v2403_v1  ;;  %1974 = vmatprep.subr.bf16.mxu1 %v2403_v1 }
  0xc2   :  { %1955 = vmatpush3.bf16.msra.mxu0 %v2235_v44  ;;  %1975 = vmatpush3.bf16.msra.mxu1 %v2235_v44 }
  0xc3   :  { %1980 = vmatprep.subr.bf16.mxu0 %v2403_v1  ;;  %2000 = vmatprep.subr.bf16.mxu1 %v2403_v1 }
  0xc5   :  { %1957 = vmatmul.mubr.bf16.vlgmr.msra.gmra.mxu0 %v605_v45  ;;  %1977 = vmatmul.mubr.bf16.vlgmr.msra.gmra.mxu1 %v602_v39 }
  0xc6   :  { %1981 = vmatpush3.bf16.msra.mxu0 %v2228_v33  ;;  %2001 = vmatpush3.bf16.msra.mxu1 %v2236_v46 }
  0xc7   :  { %1982 = vmatprep.subr.bf16.mxu0 %v2403_v1  ;;  %2002 = vmatprep.subr.bf16.mxu1 %v2403_v1 }
  0xc8   :  { %1996 = vmatprep.mubr.msk.bf16.mxu0 %vm2404_vm0, %v2403_v1  ;;  %2016 = vmatprep.mubr.msk.bf16.mxu1 %vm2404_vm0, %v2403_v1 }
  0xca   :  { %1983 = vmatpush3.bf16.msra.mxu0 %v2229_v34  ;;  %2003 = vmatpush3.bf16.msra.mxu1 %v2237_v47 }
  0xcb   :  { %1984 = vmatprep.subr.bf16.mxu0 %v2403_v1  ;;  %2004 = vmatprep.subr.bf16.mxu1 %v2403_v1 }
  0xce   :  { %1985 = vmatpush3.bf16.msra.mxu0 %v2230_v35  ;;  %2005 = vmatpush3.bf16.msra.mxu1 %v2238_v48 }
  0xcf   :  { %1986 = vmatprep.subr.bf16.mxu0 %v2403_v1  ;;  %2006 = vmatprep.subr.bf16.mxu1 %v2403_v1 }
  0xd2   :  { %1987 = vmatpush3.bf16.msra.mxu0 %v2231_v36  ;;  %2007 = vmatpush3.bf16.msra.mxu1 %v2239_v49 }
  0xd3   :  { %1988 = vmatprep.subr.bf16.mxu0 %v2403_v1  ;;  %2008 = vmatprep.subr.bf16.mxu1 %v2403_v1 }
  0xd6   :  { %1989 = vmatpush3.bf16.msra.mxu0 %v2232_v37  ;;  %2009 = vmatpush3.bf16.msra.mxu1 %v2240_v50 }
  0xd7   :  { %1990 = vmatprep.subr.bf16.mxu0 %v2403_v1  ;;  %2010 = vmatprep.subr.bf16.mxu1 %v2403_v1 }
  0xda   :  { %1991 = vmatpush3.bf16.msra.mxu0 %v2233_v40  ;;  %2011 = vmatpush3.bf16.msra.mxu1 %v2241_v51 }
  0xdb   :  { %1992 = vmatprep.subr.bf16.mxu0 %v2403_v1  ;;  %2012 = vmatprep.subr.bf16.mxu1 %v2403_v1 }
  0xde   :  { %1993 = vmatpush3.bf16.msra.mxu0 %v2234_v42  ;;  %2013 = vmatpush3.bf16.msra.mxu1 %v2242_v53 }
  0xdf   :  { %1994 = vmatprep.subr.bf16.mxu0 %v2403_v1  ;;  %2014 = vmatprep.subr.bf16.mxu1 %v2403_v1 }
  0xe2   :  { %1995 = vmatpush3.bf16.msra.mxu0 %v2235_v44  ;;  %2015 = vmatpush3.bf16.msra.mxu1 %v2243_v55 }
  0xe3   :  { %2020 = vmatprep.subr.bf16.mxu0 %v2403_v1  ;;  %2040 = vmatprep.subr.bf16.mxu1 %v2403_v1 }
  0xe5   :  { %1997 = vmatmul.mubr.bf16.vlgmr.msra.gmra.mxu0 %v608_v56  ;;  %2017 = vmatmul.mubr.bf16.vlgmr.msra.gmra.mxu1 %v2501_v29 }
  0xe6   :  { %2021 = vmatpush3.bf16.msra.mxu0 %v2236_v46  ;;  %2041 = vmatpush3.bf16.msra.mxu1 %v2236_v46 }
  0xe7   :  { %2022 = vmatprep.subr.bf16.mxu0 %v2403_v1  ;;  %2042 = vmatprep.subr.bf16.mxu1 %v2403_v1 }
  0xe8   :  { %2036 = vmatprep.mubr.msk.bf16.mxu0 %vm2404_vm0, %v2403_v1  ;;  %2056 = vmatprep.mubr.msk.bf16.mxu1 %vm2404_vm0, %v2403_v1 }
  0xea   :  { %2023 = vmatpush3.bf16.msra.mxu0 %v2237_v47  ;;  %2043 = vmatpush3.bf16.msra.mxu1 %v2237_v47 }
  0xeb   :  { %2024 = vmatprep.subr.bf16.mxu0 %v2403_v1  ;;  %2044 = vmatprep.subr.bf16.mxu1 %v2403_v1 }
  0xee   :  { %2025 = vmatpush3.bf16.msra.mxu0 %v2238_v48  ;;  %2045 = vmatpush3.bf16.msra.mxu1 %v2238_v48 }
  0xef   :  { %2026 = vmatprep.subr.bf16.mxu0 %v2403_v1  ;;  %2046 = vmatprep.subr.bf16.mxu1 %v2403_v1 }
  0xf2   :  { %2027 = vmatpush3.bf16.msra.mxu0 %v2239_v49  ;;  %2047 = vmatpush3.bf16.msra.mxu1 %v2239_v49 }
  0xf3   :  { %2028 = vmatprep.subr.bf16.mxu0 %v2403_v1  ;;  %2048 = vmatprep.subr.bf16.mxu1 %v2403_v1 }
  0xf6   :  { %2029 = vmatpush3.bf16.msra.mxu0 %v2240_v50  ;;  %2049 = vmatpush3.bf16.msra.mxu1 %v2240_v50 }
  0xf7   :  { %2030 = vmatprep.subr.bf16.mxu0 %v2403_v1  ;;  %2050 = vmatprep.subr.bf16.mxu1 %v2403_v1 }
  0xfa   :  { %2031 = vmatpush3.bf16.msra.mxu0 %v2241_v51  ;;  %2051 = vmatpush3.bf16.msra.mxu1 %v2241_v51 }
  0xfb   :  { %2032 = vmatprep.subr.bf16.mxu0 %v2403_v1  ;;  %2052 = vmatprep.subr.bf16.mxu1 %v2403_v1 }
  0xfe   :  { %2033 = vmatpush3.bf16.msra.mxu0 %v2242_v53  ;;  %2053 = vmatpush3.bf16.msra.mxu1 %v2242_v53 }
  0xff   :  { %2034 = vmatprep.subr.bf16.mxu0 %v2403_v1  ;;  %2054 = vmatprep.subr.bf16.mxu1 %v2403_v1 }
 0x102   :  { %2035 = vmatpush3.bf16.msra.mxu0 %v2243_v55  ;;  %2055 = vmatpush3.bf16.msra.mxu1 %v2243_v55 }
 0x103   :  { %2060 = vmatprep.subr.bf16.mxu0 %v2403_v1  ;;  %2080 = vmatprep.subr.bf16.mxu1 %v2403_v1 }
 0x105   :  { %2037 = vmatmul.mubr.bf16.vlgmr.msra.gmra.mxu0 %v2492_v20  ;;  %2057 = vmatmul.mubr.bf16.vlgmr.msra.gmra.mxu1 %v2525_v32 }
 0x106   :  { %2061 = vmatpush3.bf16.msra.mxu0 %v2244_v57  ;;  %2081 = vmatpush3.bf16.msra.mxu1 %v2244_v57 }
 0x107   :  { %2062 = vmatprep.subr.bf16.mxu0 %v2403_v1  ;;  %2082 = vmatprep.subr.bf16.mxu1 %v2403_v1 }
 0x108   :  { %2076 = vmatprep.mubr.msk.bf16.mxu0 %vm2404_vm0, %v2403_v1  ;;  %2096 = vmatprep.mubr.msk.bf16.mxu1 %vm2404_vm0, %v2403_v1 }
 0x10a   :  { %2063 = vmatpush3.bf16.msra.mxu0 %v2245_v58  ;;  %2083 = vmatpush3.bf16.msra.mxu1 %v2245_v58 }
 0x10b   :  { %2064 = vmatprep.subr.bf16.mxu0 %v2403_v1  ;;  %2084 = vmatprep.subr.bf16.mxu1 %v2403_v1 }
 0x10e   :  { %2065 = vmatpush3.bf16.msra.mxu0 %v2246_v59  ;;  %2085 = vmatpush3.bf16.msra.mxu1 %v2246_v59 }
 0x10f   :  { %2066 = vmatprep.subr.bf16.mxu0 %v2403_v1  ;;  %2086 = vmatprep.subr.bf16.mxu1 %v2403_v1 }
 0x112   :  { %2067 = vmatpush3.bf16.msra.mxu0 %v2247_v60  ;;  %2087 = vmatpush3.bf16.msra.mxu1 %v2247_v60 }
 0x113   :  { %2068 = vmatprep.subr.bf16.mxu0 %v2403_v1  ;;  %2088 = vmatprep.subr.bf16.mxu1 %v2403_v1 }
 0x116   :  { %2069 = vmatpush3.bf16.msra.mxu0 %v2248_v61  ;;  %2089 = vmatpush3.bf16.msra.mxu1 %v2248_v61 }
 0x117   :  { %2070 = vmatprep.subr.bf16.mxu0 %v2403_v1  ;;  %2090 = vmatprep.subr.bf16.mxu1 %v2403_v1 }
 0x11a   :  { %2071 = vmatpush3.bf16.msra.mxu0 %v2249_v0  ;;  %2091 = vmatpush3.bf16.msra.mxu1 %v2249_v0 }
 0x11b   :  { %2072 = vmatprep.subr.bf16.mxu0 %v2403_v1  ;;  %2092 = vmatprep.subr.bf16.mxu1 %v2403_v1 }
 0x11e   :  { %2073 = vmatpush3.bf16.msra.mxu0 %v2250_v3  ;;  %2093 = vmatpush3.bf16.msra.mxu1 %v2250_v3 }
 0x11f   :  { %2074 = vmatprep.subr.bf16.mxu0 %v2403_v1  ;;  %2094 = vmatprep.subr.bf16.mxu1 %v2403_v1 }
 0x122   :  { %2075 = vmatpush3.bf16.msra.mxu0 %v2251_v5  ;;  %2095 = vmatpush3.bf16.msra.mxu1 %v2251_v5 }
 0x123   :  { %2100 = vmatprep.subr.bf16.mxu0 %v2403_v1  ;;  %2120 = vmatprep.subr.bf16.mxu1 %v2403_v1 }
 0x125   :  { %v209_v8 = vpop.f32.mrf.mxu0  ;;  %v249_v9 = vpop.f32.mrf.mxu1  ;;  %2077 = vmatmul.mubr.bf16.vlgmr.msra.gmra.mxu0 %v1099_v6  ;;  %2097 = vmatmul.mubr.bf16.vlgmr.msra.gmra.mxu1 %v1096_v63  ;;  %v2658_v6 = vand.u32 127, %v93_v62 }
 0x126   :  { %v2614_v10 = vadd.f32 %v249_v9, %v209_v8  ;;  %2101 = vmatpush3.bf16.msra.mxu0 %v2244_v57  ;;  %2121 = vmatpush3.bf16.msra.mxu1 %v2252_v7 }
 0x127   :  { %v1838_v12 = vpop.f32.mrf.mxu0  ;;  %v1858_v13 = vpop.f32.mrf.mxu1  ;;  %2102 = vmatprep.subr.bf16.mxu0 %v2403_v1  ;;  %2122 = vmatprep.subr.bf16.mxu1 %v2403_v1  ;;  %vm594_vm7 = vcmp.eq.s32.totalorder %v2658_v6, 2  ;;  %vm592_vm8 = vcmp.eq.s32.totalorder %v2658_v6, 1  ;;  %vm589_vm9 = vcmp.eq.s32.totalorder %v2658_v6, 0 }
 0x128   :  { %2116 = vmatprep.mubr.msk.bf16.mxu0 %vm2404_vm0, %v2403_v1  ;;  %2136 = vmatprep.mubr.msk.bf16.mxu1 %vm2404_vm0, %v2403_v1 }
 0x129   :  { %v212_v14 = vpop.f32.mrf.mxu0  ;;  %v252_v15 = vpop.f32.mrf.mxu1 }
 0x12a   :  { %2103 = vmatpush3.bf16.msra.mxu0 %v2245_v58  ;;  %2123 = vmatpush3.bf16.msra.mxu1 %v2253_v11 }
 0x12b   :  { %v1839_v17 = vpop.f32.mrf.mxu0  ;;  %v1859_v18 = vpop.f32.mrf.mxu1  ;;  %2104 = vmatprep.subr.bf16.mxu0 %v2403_v1  ;;  %2124 = vmatprep.subr.bf16.mxu1 %v2403_v1 }
 0x12e   :  { %2105 = vmatpush3.bf16.msra.mxu0 %v2246_v59  ;;  %2125 = vmatpush3.bf16.msra.mxu1 %v2254_v16 }
 0x12f   :  { %2106 = vmatprep.subr.bf16.mxu0 %v2403_v1  ;;  %2126 = vmatprep.subr.bf16.mxu1 %v2403_v1 }
 0x132   :  { %2107 = vmatpush3.bf16.msra.mxu0 %v2247_v60  ;;  %2127 = vmatpush3.bf16.msra.mxu1 %v2255_v19 }
 0x133   :  { %2108 = vmatprep.subr.bf16.mxu0 %v2403_v1  ;;  %2128 = vmatprep.subr.bf16.mxu1 %v2403_v1 }
 0x136   :  { %2109 = vmatpush3.bf16.msra.mxu0 %v2248_v61  ;;  %2129 = vmatpush3.bf16.msra.mxu1 %v2256_v21 }
 0x137   :  { %2110 = vmatprep.subr.bf16.mxu0 %v2403_v1  ;;  %2130 = vmatprep.subr.bf16.mxu1 %v2403_v1 }
 0x13a   :  { %2111 = vmatpush3.bf16.msra.mxu0 %v2249_v0  ;;  %2131 = vmatpush3.bf16.msra.mxu1 %v2257_v22 }
 0x13b   :  { %2112 = vmatprep.subr.bf16.mxu0 %v2403_v1  ;;  %2132 = vmatprep.subr.bf16.mxu1 %v2403_v1 }
 0x13e   :  { %2113 = vmatpush3.bf16.msra.mxu0 %v2250_v3  ;;  %2133 = vmatpush3.bf16.msra.mxu1 %v2258_v24 }
 0x13f   :  { %2114 = vmatprep.subr.bf16.mxu0 %v2403_v1  ;;  %2134 = vmatprep.subr.bf16.mxu1 %v2403_v1 }
 0x142   :  { %2115 = vmatpush3.bf16.msra.mxu0 %v2251_v5  ;;  %2135 = vmatpush3.bf16.msra.mxu1 %v2259_v26 }
 0x143   :  { %2140 = vmatprep.subr.bf16.mxu0 %v2403_v1  ;;  %2160 = vmatprep.subr.bf16.mxu1 %v2403_v1 }
 0x145   :  { %v289_v28 = vpop.f32.mrf.mxu0  ;;  %v394_v30 = vpop.f32.mrf.mxu1  ;;  %2117 = vmatmul.mubr.bf16.vlgmr.msra.gmra.mxu0 %v1102_v27  ;;  %2137 = vmatmul.mubr.bf16.vlgmr.msra.gmra.mxu1 %v2501_v29 }
 0x146   :  { %2141 = vmatpush3.bf16.msra.mxu0 %v2252_v7  ;;  %2161 = vmatpush3.bf16.msra.mxu1 %v2252_v7  ;;  %v295_v37 = vadd.f32 %v289_v28, %v2614_v10  ;;  %v482_v10 = vstv %s481_s4 }
 0x147   :  { %v1878_v31 = vpop.f32.mrf.mxu0  ;;  %v1898_v33 = vpop.f32.mrf.mxu1  ;;  %2142 = vmatprep.subr.bf16.mxu0 %v2403_v1  ;;  %2162 = vmatprep.subr.bf16.mxu1 %v2403_v1  ;;  %vm2661_vm1 = vcmp.lt.s32.totalorder %v2658_v6, %v482_v10 }
 0x148   :  { %2156 = vmatprep.mubr.msk.bf16.mxu0 %vm2404_vm0, %v2403_v1  ;;  %2176 = vmatprep.mubr.msk.bf16.mxu1 %vm2404_vm0, %v2403_v1  ;;  %v515_v38 = vmul.f32 0.5, %v295_v37 }
 0x149   :  { %v292_v34 = vpop.f32.mrf.mxu0  ;;  %v397_v35 = vpop.f32.mrf.mxu1 }
 0x14a   :  { %2143 = vmatpush3.bf16.msra.mxu0 %v2253_v11  ;;  %2163 = vmatpush3.bf16.msra.mxu1 %v2253_v11  ;;  %v517_v39 = vrot.slane %v515_v38, 3 }
 0x14b   :  { %v1879_v36 = vpop.f32.mrf.mxu0  ;;  %v1899_v29 = vpop.f32.mrf.mxu1  ;;  %2144 = vmatprep.subr.bf16.mxu0 %v2403_v1  ;;  %2164 = vmatprep.subr.bf16.mxu1 %v2403_v1 }
 0x14c   :  { %v519_v43 = vsub.f32 %v295_v37, %v517_v39  ;;  %v520_v44 = vadd.f32 %v517_v39, %v295_v37 }
 0x14e   :  { %2145 = vmatpush3.bf16.msra.mxu0 %v2254_v16  ;;  %2165 = vmatpush3.bf16.msra.mxu1 %v2254_v16 }
 0x14f   :  { %2146 = vmatprep.subr.bf16.mxu0 %v2403_v1  ;;  %2166 = vmatprep.subr.bf16.mxu1 %v2403_v1 }
 0x152   :  { %2147 = vmatpush3.bf16.msra.mxu0 %v2255_v19  ;;  %2167 = vmatpush3.bf16.msra.mxu1 %v2255_v19 }
 0x153   :  { %2148 = vmatprep.subr.bf16.mxu0 %v2403_v1  ;;  %2168 = vmatprep.subr.bf16.mxu1 %v2403_v1 }
 0x156   :  { %2149 = vmatpush3.bf16.msra.mxu0 %v2256_v21  ;;  %2169 = vmatpush3.bf16.msra.mxu1 %v2256_v21 }
 0x157   :  { %2150 = vmatprep.subr.bf16.mxu0 %v2403_v1  ;;  %2170 = vmatprep.subr.bf16.mxu1 %v2403_v1 }
 0x15a   :  { %2151 = vmatpush3.bf16.msra.mxu0 %v2257_v22  ;;  %2171 = vmatpush3.bf16.msra.mxu1 %v2257_v22 }
 0x15b   :  { %2152 = vmatprep.subr.bf16.mxu0 %v2403_v1  ;;  %2172 = vmatprep.subr.bf16.mxu1 %v2403_v1 }
 0x15e   :  { %2153 = vmatpush3.bf16.msra.mxu0 %v2258_v24  ;;  %2173 = vmatpush3.bf16.msra.mxu1 %v2258_v24 }
 0x15f   :  { %2154 = vmatprep.subr.bf16.mxu0 %v2403_v1  ;;  %2174 = vmatprep.subr.bf16.mxu1 %v2403_v1  ;;  %v535_v1 = vsub.f32 %v520_v44, %v519_v43 }
 0x161   :  { %v540_v7 = vrot.slane %v535_v1, 2 }
 0x162   :  { %2155 = vmatpush3.bf16.msra.mxu0 %v2259_v26  ;;  %2175 = vmatpush3.bf16.msra.mxu1 %v2259_v26 }
 0x165   :  { %v434_v40 = vpop.f32.mrf.mxu0  ;;  %v474_v41 = vpop.f32.mrf.mxu1  ;;  %2157 = vmatmul.mubr.bf16.vlgmr.msra.gmra.mxu0 %v2492_v20  ;;  %2177 = vmatmul.mubr.bf16.vlgmr.msra.gmra.mxu1 %v2525_v32  ;;  %v537_v20 = vrot.slane %v535_v1, 1 }
 0x166   :  { %v435_v42 = vadd.f32 %v434_v40, %v394_v30 }
 0x167   :  { %v1918_v45 = vpop.f32.mrf.mxu0  ;;  %v1938_v46 = vpop.f32.mrf.mxu1  ;;  %v539_v2 = vmul.f32 %v537_v20, %v535_v1 }
 0x168   :  { %v480_v47 = vadd.f32 %v474_v41, %v435_v42 }
 0x169   :  { %v437_v48 = vpop.f32.mrf.mxu0  ;;  %v477_v49 = vpop.f32.mrf.mxu1  ;;  %v542_v13 = vmul.f32 %v540_v7, %v539_v2 }
 0x16a   :  { %v521_v50 = vmul.f32 0.5, %v480_v47  ;;  %v484_v51 = vsub.f32 %v295_v37, %v480_v47 }
 0x16b   :  { %v1919_v52 = vpop.f32.mrf.mxu0  ;;  %v1939_v53 = vpop.f32.mrf.mxu1 }
 0x16c   :  { %v523_v54 = vrot.slane %v521_v50, 3  ;;  %v485_v55 = vand.u32 2147483647, %v484_v51 }
 0x16e   :  { %v525_v56 = vsub.f32 %v480_v47, %v523_v54  ;;  %v526_v57 = vadd.f32 %v523_v54, %v480_v47  ;;  %486 = vadd.xlane.f32.xlu0 %v485_v55 }
 0x170   :  { %v527_v32 = vmin.f32 %v520_v44, %v526_v57  ;;  %v528_v58 = vmax.f32 %v519_v43, %v525_v56  ;;  %v531_v59 = vmax.f32 %v520_v44, %v526_v57  ;;  %v532_v60 = vmin.f32 %v519_v43, %v525_v56 }
 0x171   :  { %v543_v61 = vsub.f32 %v526_v57, %v525_v56 }
 0x172   :  { %v529_v63 = vsub.f32 %v527_v32, %v528_v58  ;;  %v533_v0 = vsub.f32 %v531_v59, %v532_v60 }
 0x173   :  { %v545_v3 = vrot.slane %v543_v61, 1  ;;  %v548_v9 = vrot.slane %v543_v61, 2 }
 0x174   :  { %v530_v4 = vmax.f32 %v529_v63, 0.0  ;;  %v534_v5 = vmax.f32 %v533_v0, 0.0 }
 0x175   :  { %v547_v8 = vmul.f32 %v545_v3, %v543_v61 }
 0x176   :  { %v552_v11 = vrot.slane %v530_v4, 1  ;;  %v559_v12 = vrot.slane %v534_v5, 1  ;;  %v555_v16 = vrot.slane %v530_v4, 2  ;;  %v562_v18 = vrot.slane %v534_v5, 2 }
 0x177   :  { %v550_v14 = vmul.f32 %v548_v9, %v547_v8 }
 0x178   :  { %v554_v15 = vmul.f32 %v552_v11, %v530_v4  ;;  %v561_v17 = vmul.f32 %v559_v12, %v534_v5 }
 0x179   :  { %v565_v21 = vadd.f32 %v550_v14, %v542_v13 }
 0x17a   :  { %v557_v22 = vmul.f32 %v555_v16, %v554_v15  ;;  %v564_v23 = vmul.f32 %v562_v18, %v561_v17 }
 0x17c   :  { %v566_v24 = vsub.f32 %v565_v21, %v557_v22  ;;  %v568_v25 = vsel %vm2661_vm1, %v564_v23, 1.0 }
 0x17d   :  { %2260 = vrcp.f32 %v568_v25 }
 0x17e   :  { %v567_v26 = vsel %vm2661_vm1, %v566_v24, 1.0 }
 0x17f   :  { %2262 = vrcp.f32 %v567_v26  ;;  %v571_v27 = vsub.f32 %v568_v25, %v567_v26 }
 0x185   :  { %v708_v28 = vpop.f32.mrf.mxu0  ;;  %v748_v30 = vpop.f32.mrf.mxu1 }
 0x186   :  { %v749_v31 = vadd.f32 %v748_v30, %v708_v28 }
 0x187   :  { %v1958_v33 = vpop.f32.mrf.mxu0  ;;  %v1978_v34 = vpop.f32.mrf.mxu1 }
 0x189   :  { %v711_v35 = vpop.f32.mrf.mxu0  ;;  %v751_v36 = vpop.f32.mrf.mxu1 }
 0x18a   :  { %v2261_v29 = vpop.eup %2260 }
 0x18b   :  { %v1959_v37 = vpop.f32.mrf.mxu0  ;;  %v1979_v38 = vpop.f32.mrf.mxu1  ;;  %v2669_v39 = vmul.f32 %v2261_v29, %v571_v27  ;;  %v982_v27 = vstv %s1640_s5 }
 0x18c   :  { %v2263_v40 = vpop.eup %2262  ;;  %vm2676_vm2 = vcmp.lt.s32.totalorder %v2658_v6, %v982_v27 }
 0x18d   :  { %v2671_v41 = vmul.f32 %v2263_v40, %v557_v22 }
 0x18f   :  { %v574_v42 = vsub.f32 %v2671_v41, %v2669_v39 }
 0x1a5   :  { %v788_v43 = vpop.f32.mrf.mxu0  ;;  %v894_v44 = vpop.f32.mrf.mxu1 }
 0x1a6   :  { %v794_v51 = vadd.f32 %v788_v43, %v749_v31 }
 0x1a7   :  { %v1998_v45 = vpop.f32.mrf.mxu0  ;;  %v2018_v46 = vpop.f32.mrf.mxu1 }
 0x1a8   :  { %v1013_v1 = vmul.f32 0.5, %v794_v51 }
 0x1a9   :  { %v791_v47 = vpop.f32.mrf.mxu0  ;;  %v897_v48 = vpop.f32.mrf.mxu1 }
 0x1aa   :  { %v1015_v52 = vrot.slane %v1013_v1, 3 }
 0x1ab   :  { %v1999_v49 = vpop.f32.mrf.mxu0  ;;  %v2019_v50 = vpop.f32.mrf.mxu1 }
 0x1ac   :  { %v1017_v56 = vsub.f32 %v794_v51, %v1015_v52  ;;  %v1018_v57 = vadd.f32 %v1015_v52, %v794_v51 }
 0x1ae   :  { %v1033_v63 = vsub.f32 %v1018_v57, %v1017_v56 }
 0x1b0   :  { %v1035_v8 = vrot.slane %v1033_v63, 1  ;;  %v1038_v22 = vrot.slane %v1033_v63, 2 }
 0x1b2   :  { %v1037_v16 = vmul.f32 %v1035_v8, %v1033_v63 }
 0x1b4   :  { %v1040_v28 = vmul.f32 %v1038_v22, %v1037_v16 }
 0x1c5   :  { %v934_v53 = vpop.f32.mrf.mxu0  ;;  %v974_v54 = vpop.f32.mrf.mxu1 }
 0x1c6   :  { %v935_v55 = vadd.f32 %v934_v53, %v894_v44 }
 0x1c7   :  { %v2038_v20 = vpop.f32.mrf.mxu0  ;;  %v2058_v32 = vpop.f32.mrf.mxu1 }
 0x1c8   :  { %v980_v58 = vadd.f32 %v974_v54, %v935_v55 }
 0x1c9   :  { %v937_v59 = vpop.f32.mrf.mxu0  ;;  %v977_v60 = vpop.f32.mrf.mxu1 }
 0x1ca   :  { %v1019_v61 = vmul.f32 0.5, %v980_v58  ;;  %v984_v62 = vsub.f32 %v794_v51, %v980_v58 }
 0x1cb   :  { %v2039_v0 = vpop.f32.mrf.mxu0  ;;  %v2059_v2 = vpop.f32.mrf.mxu1 }
 0x1cc   :  { %v1021_v3 = vrot.slane %v1019_v61, 3  ;;  %v985_v4 = vand.u32 2147483647, %v984_v62 }
 0x1ce   :  { %v1023_v5 = vsub.f32 %v980_v58, %v1021_v3  ;;  %v1024_v7 = vadd.f32 %v1021_v3, %v980_v58  ;;  %986 = vadd.xlane.f32.xlu0 %v985_v4 }
 0x1d0   :  { %v1025_v9 = vmin.f32 %v1018_v57, %v1024_v7  ;;  %v1026_v10 = vmax.f32 %v1017_v56, %v1023_v5  ;;  %v1029_v11 = vmax.f32 %v1018_v57, %v1024_v7  ;;  %v1030_v12 = vmin.f32 %v1017_v56, %v1023_v5 }
 0x1d1   :  { %v1041_v13 = vsub.f32 %v1024_v7, %v1023_v5 }
 0x1d2   :  { %v1027_v14 = vsub.f32 %v1025_v9, %v1026_v10  ;;  %v1031_v15 = vsub.f32 %v1029_v11, %v1030_v12 }
 0x1d3   :  { %v1043_v17 = vrot.slane %v1041_v13, 1  ;;  %v1046_v24 = vrot.slane %v1041_v13, 2 }
 0x1d4   :  { %v1028_v18 = vmax.f32 %v1027_v14, 0.0  ;;  %v1032_v21 = vmax.f32 %v1031_v15, 0.0 }
 0x1d5   :  { %v1045_v23 = vmul.f32 %v1043_v17, %v1041_v13 }
 0x1d6   :  { %v1050_v25 = vrot.slane %v1028_v18, 1  ;;  %v1057_v26 = vrot.slane %v1032_v21, 1  ;;  %v1053_v33 = vrot.slane %v1028_v18, 2  ;;  %v1060_v35 = vrot.slane %v1032_v21, 2 }
 0x1d7   :  { %v1048_v30 = vmul.f32 %v1046_v24, %v1045_v23 }
 0x1d8   :  { %v1052_v31 = vmul.f32 %v1050_v25, %v1028_v18  ;;  %v1059_v34 = vmul.f32 %v1057_v26, %v1032_v21 }
 0x1d9   :  { %v1063_v37 = vadd.f32 %v1048_v30, %v1040_v28 }
 0x1da   :  { %v1055_v36 = vmul.f32 %v1053_v33, %v1052_v31  ;;  %v1062_v29 = vmul.f32 %v1060_v35, %v1059_v34  ;;  %v575_v35 = vsub.f32 1.0, %v574_v42 }
 0x1dc   :  { %v1064_v40 = vsub.f32 %v1063_v37, %v1055_v36  ;;  %v1066_v44 = vsel %vm2676_vm2, %v1062_v29, 1.0 }
 0x1de   :  { %v1065_v43 = vsel %vm2676_vm2, %v1064_v40, 1.0 }
 0x1df   :  { %2264 = vrcp.f32 %v1065_v43  ;;  %v1069_v56 = vsub.f32 %v1066_v44, %v1065_v43 }
 0x1e0   :  { %2266 = vrcp.f32 %v1066_v44 }
 0x1e5   :  { %v1202_v45 = vpop.f32.mrf.mxu0  ;;  %v1242_v46 = vpop.f32.mrf.mxu1 }
 0x1e6   :  { %v1243_v47 = vadd.f32 %v1242_v46, %v1202_v45  ;;  %v576_v45 = vsel %vm2661_vm1, %v575_v35, 0.0 }
 0x1e7   :  { %v2078_v48 = vpop.f32.mrf.mxu0  ;;  %v2098_v49 = vpop.f32.mrf.mxu1  ;;  %v578_v41 = vsel %vm577_vm4, %v576_v45, 0.0 }
 0x1e9   :  { %v1205_v50 = vpop.f32.mrf.mxu0  ;;  %v1245_v51 = vpop.f32.mrf.mxu1 }
 0x1eb   :  { %v2079_v1 = vpop.f32.mrf.mxu0  ;;  %v2099_v52 = vpop.f32.mrf.mxu1 }
 0x1ec   :  { %v2265_v53 = vpop.eup %2264  ;;  %v1476_v52 = vstv %s1657_s23 }
 0x1ed   :  { %v2267_v54 = vpop.eup %2266  ;;  %v1068_v55 = vmul.f32 %v2265_v53, %v1055_v36  ;;  %vm2696_vm6 = vcmp.lt.s32.totalorder %v2658_v6, %v1476_v52 }
 0x1ee   :  { %v1071_v57 = vmul.f32 %v2267_v54, %v1069_v56 }
 0x1f0   :  { %v1072_v20 = vsub.f32 %v1068_v55, %v1071_v57 }
 0x1f2   :  { %v1073_v58 = vsub.f32 1.0, %v1072_v20 }
 0x1f4   :  { %v1074_v61 = vsel %vm2676_vm2, %v1073_v58, 0.0 }
 0x1f5   :  { %v1075_v62 = vsel %vm577_vm4, %v1074_v61, 0.0 }
 0x1f7   :  { %v487_v32 = vpop.xlane.xlu0 %486 }
 0x1f8   :  { %v501_v59 = vrot.slane %v487_v32, 6  ;;  %v489_v44 = vsel %vm488_vm5, %v487_v32, 0.0 }
 0x1fa   :  { %v504_v60 = vsel %vm503_vm3, %v501_v59, 0.0 }
 0x1fb   :  { %505 = vadd.xlane.f32.xlu0 %v504_v60 }
 0x1ff   :  { %1076 = vadd.xlane.f32.xlu0 %v1075_v62 }
 0x205   :  { %v1282_v63 = vpop.f32.mrf.mxu0  ;;  %v1388_v0 = vpop.f32.mrf.mxu1 }
 0x206   :  { %v1288_v9 = vadd.f32 %v1282_v63, %v1243_v47 }
 0x207   :  { %v2118_v2 = vpop.f32.mrf.mxu0  ;;  %v2138_v3 = vpop.f32.mrf.mxu1 }
 0x208   :  { %v1507_v10 = vmul.f32 0.5, %v1288_v9 }
 0x209   :  { %v1285_v4 = vpop.f32.mrf.mxu0  ;;  %v1391_v5 = vpop.f32.mrf.mxu1 }
 0x20a   :  { %v1509_v11 = vrot.slane %v1507_v10, 3 }
 0x20b   :  { %v2119_v7 = vpop.f32.mrf.mxu0  ;;  %v2139_v8 = vpop.f32.mrf.mxu1 }
 0x20c   :  { %v1511_v15 = vsub.f32 %v1288_v9, %v1509_v11  ;;  %v1512_v16 = vadd.f32 %v1509_v11, %v1288_v9 }
 0x20e   :  { %v1527_v26 = vsub.f32 %v1512_v16, %v1511_v15 }
 0x210   :  { %v1529_v36 = vrot.slane %v1527_v26, 1  ;;  %v1532_v42 = vrot.slane %v1527_v26, 2 }
 0x212   :  { %v1531_v48 = vmul.f32 %v1529_v36, %v1527_v26 }
 0x214   :  { %v1534_v55 = vmul.f32 %v1532_v42, %v1531_v48 }
 0x225   :  { %v1428_v12 = vpop.f32.mrf.mxu0  ;;  %v1468_v13 = vpop.f32.mrf.mxu1 }
 0x226   :  { %v1429_v14 = vadd.f32 %v1428_v12, %v1388_v0 }
 0x227   :  { %v2158_v17 = vpop.f32.mrf.mxu0  ;;  %v2178_v18 = vpop.f32.mrf.mxu1 }
 0x228   :  { %v1474_v21 = vadd.f32 %v1468_v13, %v1429_v14 }
 0x229   :  { %v1431_v22 = vpop.f32.mrf.mxu0  ;;  %v1471_v23 = vpop.f32.mrf.mxu1 }
 0x22a   :  { %v1513_v24 = vmul.f32 0.5, %v1474_v21  ;;  %v1478_v25 = vsub.f32 %v1288_v9, %v1474_v21 }
 0x22b   :  { %v2159_v27 = vpop.f32.mrf.mxu0  ;;  %v2179_v28 = vpop.f32.mrf.mxu1 }
 0x22c   :  { %v1515_v30 = vrot.slane %v1513_v24, 3  ;;  %v1479_v31 = vand.u32 2147483647, %v1478_v25 }
 0x22e   :  { %v1517_v33 = vsub.f32 %v1474_v21, %v1515_v30  ;;  %v1518_v34 = vadd.f32 %v1515_v30, %v1474_v21  ;;  %1480 = vadd.xlane.f32.xlu1 %v1479_v31 }
 0x230   :  { %v1519_v29 = vmin.f32 %v1512_v16, %v1518_v34  ;;  %v1520_v37 = vmax.f32 %v1511_v15, %v1517_v33  ;;  %v1523_v38 = vmax.f32 %v1512_v16, %v1518_v34  ;;  %v1524_v40 = vmin.f32 %v1511_v15, %v1517_v33 }
 0x231   :  { %v1535_v43 = vsub.f32 %v1518_v34, %v1517_v33 }
 0x232   :  { %490 = vadd.xlane.f32.xlu1 %v489_v44  ;;  %v1521_v46 = vsub.f32 %v1519_v29, %v1520_v37  ;;  %v1525_v47 = vsub.f32 %v1523_v38, %v1524_v40 }
 0x233   :  { %v1537_v49 = vrot.slane %v1535_v43, 1  ;;  %v1540_v1 = vrot.slane %v1535_v43, 2 }
 0x234   :  { %v1522_v50 = vmax.f32 %v1521_v46, 0.0  ;;  %v1526_v39 = vmax.f32 %v1525_v47, 0.0 }
 0x235   :  { %v1539_v51 = vmul.f32 %v1537_v49, %v1535_v43 }
 0x236   :  { %579 = vadd.xlane.f32.xlu1 %v578_v41  ;;  %v1544_v53 = vrot.slane %v1522_v50, 1  ;;  %v1551_v54 = vrot.slane %v1526_v39, 1  ;;  %v1547_v19 = vrot.slane %v1522_v50, 2  ;;  %v1554_v32 = vrot.slane %v1526_v39, 2 }
 0x237   :  { %v1542_v56 = vmul.f32 %v1540_v1, %v1539_v51 }
 0x238   :  { %v1546_v57 = vmul.f32 %v1544_v53, %v1522_v50  ;;  %v1553_v20 = vmul.f32 %v1551_v54, %v1526_v39 }
 0x239   :  { %v1557_v59 = vadd.f32 %v1542_v56, %v1534_v55 }
 0x23a   :  { %v1549_v60 = vmul.f32 %v1547_v19, %v1546_v57  ;;  %v1556_v61 = vmul.f32 %v1554_v32, %v1553_v20 }
 0x23c   :  { %v1558_v62 = vsub.f32 %v1557_v59, %v1549_v60  ;;  %v1560_v63 = vsel %vm2696_vm6, %v1556_v61, 1.0  ;;  %v2714_v61 = vstv %s2749_s0 }
 0x23d   :  { %2268 = vrcp.f32 %v1560_v63 }
 0x23e   :  { %v1559_v0 = vsel %vm2696_vm6, %v1558_v62, 1.0 }
 0x23f   :  { %2270 = vrcp.f32 %v1559_v0  ;;  %v1563_v2 = vsub.f32 %v1560_v63, %v1559_v0 }
 0x24a   :  { %v2269_v3 = vpop.eup %2268 }
 0x24b   :  { %v1565_v4 = vmul.f32 %v2269_v3, %v1563_v2 }
 0x24c   :  { %v2271_v5 = vpop.eup %2270 }
 0x24d   :  { %v1562_v7 = vmul.f32 %v2271_v5, %v1549_v60 }
 0x24f   :  { %v1566_v8 = vsub.f32 %v1562_v7, %v1565_v4 }
 0x251   :  { %v1567_v15 = vsub.f32 1.0, %v1566_v8 }
 0x253   :  { %v1568_v22 = vsel %vm2696_vm6, %v1567_v15, 0.0 }
 0x254   :  { %v1569_v27 = vsel %vm577_vm4, %v1568_v22, 0.0 }
 0x257   :  { %v987_v9 = vpop.xlane.xlu0 %986 }
 0x258   :  { %v1000_v10 = vrot.slane %v987_v9, 6  ;;  %v988_v11 = vsel %vm488_vm5, %v987_v9, 0.0 }
 0x259   :  { %989 = vadd.xlane.f32.xlu0 %v988_v11 }
 0x25a   :  { %v1002_v12 = vsel %vm503_vm3, %v1000_v10, 0.0 }
 0x25b   :  { %1003 = vadd.xlane.f32.xlu1 %v1002_v12 }
 0x284   :  { %v506_v13 = vpop.xlane.xlu0 %505 }
 0x285   :  { %v507_v14 = vrot.slane %v506_v13, 4 }
 0x287   :  { %v508_v16 = vadd.f32 %v507_v14, %v506_v13 }
 0x288   :  { %v1077_v47 = vpop.xlane.xlu0 %1076 }
 0x289   :  { %v509_v24 = vrot.slane %v508_v16, 2  ;;  %v1078_v48 = vrot.slane %v1077_v47, 4 }
 0x28b   :  { %v510_v31 = vadd.f32 %v509_v24, %v508_v16  ;;  %v1079_v49 = vadd.f32 %v1078_v48, %v1077_v47 }
 0x28d   :  { %v511_v29 = vrot.slane %v510_v31, 1  ;;  %v1080_v41 = vrot.slane %v1079_v49, 2 }
 0x28f   :  { %v512_v44 = vadd.f32 %v511_v29, %v510_v31  ;;  %v1081_v54 = vadd.f32 %v1080_v41, %v1079_v49 }
 0x291   :  { %v1082_v20 = vrot.slane %v1081_v54, 1 }
 0x293   :  { %v1083_v60 = vadd.f32 %v1082_v20, %v1081_v54 }
 0x2b7   :  { %v1481_v17 = vpop.xlane.xlu1 %1480 }
 0x2b8   :  { %v1494_v18 = vrot.slane %v1481_v17, 6  ;;  %v1482_v21 = vsel %vm488_vm5, %v1481_v17, 0.0 }
 0x2b9   :  { %1483 = vadd.xlane.f32.xlu1 %v1482_v21 }
 0x2ba   :  { %v1496_v23 = vsel %vm503_vm3, %v1494_v18, 0.0 }
 0x2bb   :  { %v491_v25 = vpop.xlane.xlu1 %490  ;;  %1497 = vadd.xlane.f32.xlu0 %v1496_v23 }
 0x2bc   :  { %v492_v26 = vrot.slane %v491_v25, 4 }
 0x2bd   :  { %1570 = vadd.xlane.f32.xlu1 %v1569_v27 }
 0x2be   :  { %v493_v28 = vadd.f32 %v492_v26, %v491_v25 }
 0x2bf   :  { %v580_v30 = vpop.xlane.xlu1 %579 }
 0x2c0   :  { %v494_v33 = vrot.slane %v493_v28, 2  ;;  %v581_v34 = vrot.slane %v580_v30, 4 }
 0x2c2   :  { %v582_v35 = vadd.f32 %v581_v34, %v580_v30  ;;  %v495_v36 = vadd.f32 %v494_v33, %v493_v28 }
 0x2c4   :  { %v583_v37 = vrot.slane %v582_v35, 2  ;;  %v496_v38 = vrot.slane %v495_v36, 1 }
 0x2c6   :  { %v497_v40 = vadd.f32 %v496_v38, %v495_v36  ;;  %v584_v43 = vadd.f32 %v583_v37, %v582_v35 }
 0x2c8   :  { %2180 = vpush %v497_v40  ;;  %v585_v45 = vrot.slane %v584_v43, 1 }
 0x2c9   :  { %2182 = vpush %v512_v44 }
 0x2ca   :  { %v586_v46 = vadd.f32 %v585_v45, %v584_v43 }
 0x2cc   :  { %2184 = vpush %v586_v46 }
 0x2e2   :  { %v990_v50 = vpop.xlane.xlu0 %989 }
 0x2e3   :  { %v991_v39 = vrot.slane %v990_v50, 4 }
 0x2e4   :  { %v1004_v42 = vpop.xlane.xlu1 %1003 }
 0x2e5   :  { %v992_v51 = vadd.f32 %v991_v39, %v990_v50  ;;  %v1005_v1 = vrot.slane %v1004_v42, 4 }
 0x2e7   :  { %v993_v52 = vrot.slane %v992_v51, 2  ;;  %v1006_v53 = vadd.f32 %v1005_v1, %v1004_v42 }
 0x2e9   :  { %v1007_v55 = vrot.slane %v1006_v53, 2  ;;  %v994_v56 = vadd.f32 %v993_v52, %v992_v51 }
 0x2eb   :  { %v995_v57 = vrot.slane %v994_v56, 1  ;;  %v1008_v19 = vadd.f32 %v1007_v55, %v1006_v53 }
 0x2ed   :  { %v996_v32 = vadd.f32 %v995_v57, %v994_v56  ;;  %v1009_v58 = vrot.slane %v1008_v19, 1 }
 0x2ef   :  { %2186 = vpush %v996_v32  ;;  %v1010_v59 = vadd.f32 %v1009_v58, %v1008_v19 }
 0x2f1   :  { %2188 = vpush %v1010_v59 }
 0x2f2   :  { %2190 = vpush %v1083_v60 }
 0x2f9   :  { %s2181_s24 = spop %2180 }
 0x2fa   :  { %s2183_s27 = spop %2182  ;;  %v499_v0 = vstv %s2181_s24 }
 0x2fb   :  { %v514_v62 = vstv %s2183_s27  ;;  %v591_v4 = vmul.f32 %v2714_v61, %v499_v0 }
 0x2fc   :  { %v595_v63 = vmul.f32 %v2714_v61, %v514_v62 }
 0x2fd   :  { %s2185_s28 = spop %2184 }
 0x2fe   :  { %v588_v2 = vstv %s2185_s28  ;;  %v596_v5 = vsel %vm594_vm7, %v595_v63, 0.0 }
 0x2ff   :  { %v593_v3 = vmul.f32 %v2714_v61, %v588_v2 }
 0x301   :  { %v597_v7 = vsel %vm592_vm8, %v593_v3, %v596_v5 }
 0x302   :  { %v598_v8 = vsel %vm589_vm9, %v591_v4, %v597_v7 }
 0x303   :  { %599 = vst [vmem:[#allocation13] sm:$0x1] %v598_v8 }
 0x320   :  { %s2187_s0 = spop %2186 }
 0x321   :  { %v998_v9 = vstv %s2187_s0 }
 0x322   :  { %s2189_s29 = spop %2188  ;;  %v1086_v14 = vmul.f32 %v998_v9, %v2714_v61 }
 0x323   :  { %v1012_v10 = vstv %s2189_s29  ;;  %s2191_s1 = spop %2190 }
 0x324   :  { %v1088_v11 = vmul.f32 %v1012_v10, %v2714_v61  ;;  %v1085_v12 = vstv %s2191_s1 }
 0x325   :  { %v1087_v13 = vmul.f32 %v1085_v12, %v2714_v61 }
 0x326   :  { %v1089_v15 = vsel %vm594_vm7, %v1088_v11, 0.0 }
 0x327   :  { %v1090_v16 = vsel %vm592_vm8, %v1087_v13, %v1089_v15 }
 0x328   :  { %v1091_v17 = vsel %vm589_vm9, %v1086_v14, %v1090_v16 }
 0x329   :  { %1093 = vst [vmem:[#allocation13 + $0x1] sm:$0x1] %v1091_v17 }
 0x342   :  { %v1484_v18 = vpop.xlane.xlu1 %1483 }
 0x343   :  { %v1485_v21 = vrot.slane %v1484_v18, 4 }
 0x344   :  { %v1498_v22 = vpop.xlane.xlu0 %1497 }
 0x345   :  { %v1486_v23 = vadd.f32 %v1485_v21, %v1484_v18  ;;  %v1499_v24 = vrot.slane %v1498_v22, 4 }
 0x346   :  { %v1571_v25 = vpop.xlane.xlu1 %1570 }
 0x347   :  { %v1487_v26 = vrot.slane %v1486_v23, 2  ;;  %v1500_v27 = vadd.f32 %v1499_v24, %v1498_v22  ;;  %v1572_v28 = vrot.slane %v1571_v25, 4 }
 0x349   :  { %v1501_v30 = vrot.slane %v1500_v27, 2  ;;  %v1573_v31 = vadd.f32 %v1572_v28, %v1571_v25  ;;  %v1488_v33 = vadd.f32 %v1487_v26, %v1486_v23 }
 0x34b   :  { %v1502_v34 = vadd.f32 %v1501_v30, %v1500_v27  ;;  %v1574_v35 = vrot.slane %v1573_v31, 2  ;;  %v1489_v36 = vrot.slane %v1488_v33, 1 }
 0x34d   :  { %v1575_v29 = vadd.f32 %v1574_v35, %v1573_v31  ;;  %v1490_v37 = vadd.f32 %v1489_v36, %v1488_v33  ;;  %v1503_v38 = vrot.slane %v1502_v34, 1 }
 0x34f   :  { %2192 = vpush %v1490_v37  ;;  %v1504_v40 = vadd.f32 %v1503_v38, %v1502_v34  ;;  %v1576_v43 = vrot.slane %v1575_v29, 1 }
 0x351   :  { %2194 = vpush %v1504_v40  ;;  %v1577_v44 = vadd.f32 %v1576_v43, %v1575_v29 }
 0x353   :  { %2196 = vpush %v1577_v44 }
 0x380   :  { %s2193_s30 = spop %2192 }
 0x381   :  { %v1492_v46 = vstv %s2193_s30 }
 0x382   :  { %s2195_s7 = spop %2194  ;;  %v1580_v39 = vmul.f32 %v1492_v46, %v2714_v61 }
 0x383   :  { %v1506_v45 = vstv %s2195_s7 }
 0x384   :  { %v1582_v47 = vmul.f32 %v1506_v45, %v2714_v61  ;;  %s2197_s8 = spop %2196 }
 0x385   :  { %v1579_v48 = vstv %s2197_s8 }
 0x386   :  { %v1583_v49 = vsel %vm594_vm7, %v1582_v47, 0.0  ;;  %v1581_v50 = vmul.f32 %v1579_v48, %v2714_v61 }
 0x388   :  { %v1584_v41 = vsel %vm592_vm8, %v1581_v50, %v1583_v49 }
 0x389   :  { %v1585_v42 = vsel %vm589_vm9, %v1580_v39, %v1584_v41 }
 0x38a   :  { %1587 = vst [vmem:[#allocation13 + $0x2] sm:$0x1] %v1585_v42 }
 0x38b   :  { %2375 = shalt.err (!%p2372_p1)
}
 0x38c   :  { %s2406_s12 = smov 16   ;;  %s2407_s13 = smov 1  }
 0x38d   :  { %1599 = dma.vmem_to_hbm [thread:$0]  %s1594_s9, 48, %s2755_s6, [#allocation5], %s2406_s12, %s2406_s12, %s2407_s13  }
 0x38e   :  { %2392 = dma.done.wait [#allocation5], 48  }
 0x38f   :  { %2393 = vsyncadd [#allocation5], 4294967248 }
 0x390   :  { %1603 = vsyncpa [#allocation4], 1 }
 0x391   :  { %1604 = vsyncpa [#allocation9], 1 }
 0x392   :  { %1605 = vsyncpa [#allocation12], 1 }
 0x393   :  { %1606 = vsyncpa [#allocation5], 1 }
 0x394   :  { %1607 = vsyncpa [#allocation6], 1 }

</bundles_post_ra>
